<compile_context>
chip_gen: v7x
topology: tpu7x:2x2x1
jax: 0.10.0
libtpu: 0.0.40
codegen_flags: <defaults>
</compile_context>

<pallas_src>
import functools
import math

import jax
import jax.numpy as jnp
from jax.experimental import pallas as pl
from jax.experimental.pallas import tpu as pltpu


def _layernorm(x, w, b, eps=1e-5):
    mu = jnp.mean(x, axis=-1, keepdims=True)
    var = jnp.mean((x - mu) ** 2, axis=-1, keepdims=True)
    return (x - mu) * jax.lax.rsqrt(var + eps) * w + b


def encoder_layer_kernel(
    src_ref, pos_ref,
    wqk_ref, bqk_ref,          # fused q/k in_proj (scale folded into q half): (D, 2D), (1, 2D)
    wv_ref, bv_ref,            # v in_proj:         (D, D),  (1, D)
    wo_ref, bo_ref,            # MHA out_proj:      (D, D),  (1, D)
    w1_ref, b1_ref,            # linear1:           (D, F),  (1, F)
    w2_ref, b2_ref,            # linear2:           (F, D),  (1, D)
    n1w_ref, n1b_ref,          # norm1:             (1, D)
    n2w_ref, n2b_ref,          # norm2:             (1, D)
    o_ref,                     # output block:      (S, b_blk, D)
    *, nhead, approx_recip,
):
    S, b_blk, D = src_ref.shape
    N = S * b_blk
    dh = D // nhead
    cdt = wqk_ref.dtype        # MXU compute dtype (f32 or bf16)

    # Inputs arrive in f32; residual stream / LayerNorm math stays f32.
    x_sbd = src_ref[...]
    p_sbd = pos_ref[...]

    # One in-VMEM reorder to batch-major (N = b_blk*S, D) token matrices so the
    # per-head attention contractions have a *leading* batch dim (lowerable).
    x = pltpu.einshape("sbd->bsd", x_sbd).reshape(N, D)              # value / residual branch
    qk_in = pltpu.einshape("sbd->bsd", x_sbd + p_sbd).reshape(N, D)  # pos-embedded q/k branch

    # Fused q/k projection (1/sqrt(dh) pre-folded into the q half by the
    # wrapper) and v projection: big-M matmuls, f32 accumulation.
    qk = jnp.dot(qk_in.astype(cdt), wqk_ref[...],
                 preferred_element_type=jnp.float32) + bqk_ref[...]
    q = qk[:, :D]
    k = qk[:, D:]
    v = jnp.dot(x.astype(cdt), wv_ref[...],
                preferred_element_type=jnp.float32) + bv_ref[...]

    # Multi-head attention with the out-projection folded into the head loop.
    # Static Python loop: nhead is a small compile-time constant, head slices
    # are static lane slices, and each head's s/e/probs temporaries are
    # consumed by the W_o accumulate, so live ranges stay bounded by dataflow.
    attn = jnp.zeros((N, D), jnp.float32) + bo_ref[...]
    for h in range(nhead):
        sl = slice(h * dh, (h + 1) * dh)
        qh = q[:, sl].reshape(b_blk, S, dh).astype(cdt)
        kh = k[:, sl].reshape(b_blk, S, dh).astype(cdt)
        vh = v[:, sl].reshape(b_blk, S, dh).astype(cdt)
        s = jnp.einsum("bqd,bkd->bqk", qh, kh,
                       preferred_element_type=jnp.float32)           # (b_blk, S, S)
        s = s - jnp.max(s, axis=-1, keepdims=True)
        e = jnp.exp(s)
        denom = jnp.sum(e, axis=-1, keepdims=True)
        if approx_recip:
            probs = e * pl.reciprocal(denom, approx=True)            # EUP slot
        else:
            probs = e / denom
        oh = jnp.einsum("bqk,bkd->bqd", probs.astype(cdt), vh,
                        preferred_element_type=jnp.float32)          # (b_blk, S, dh)
        # Out-projection slice for this head, accumulated in f32 registers.
        attn = attn + jnp.dot(oh.reshape(N, dh).astype(cdt), wo_ref[sl, :],
                              preferred_element_type=jnp.float32)

    # Residual + norm1 (dropout1 is identity in eval).
    src1 = _layernorm(x + attn, n1w_ref[...], n1b_ref[...])

    # FFN: linear2(relu(linear1(src1))); inner dropout identity in eval.
    # Bias+relu fused, cast to compute dtype immediately so only that copy
    # stays live for the second matmul.
    h1 = jnp.maximum(
        jnp.dot(src1.astype(cdt), w1_ref[...],
                preferred_element_type=jnp.float32) + b1_ref[...], 0.0).astype(cdt)
    ff = jnp.dot(h1, w2_ref[...],
                 preferred_element_type=jnp.float32) + b2_ref[...]

    # Residual + norm2 (dropout2 is identity in eval).
    out = _layernorm(src1 + ff, n2w_ref[...], n2b_ref[...])

    # Back to the natural (S, b_blk, D) layout of the output block.
    o_ref[...] = pltpu.einshape("bsd->sbd", out.reshape(b_blk, S, D)).astype(o_ref.dtype)


def _device_kind():
    try:
        return jax.devices()[0].device_kind.lower()
    except Exception:  # pragma: no cover
        return ""


def _vmem_limit_bytes(kind):
    if "v7" in kind:
        return 48 * 1024 * 1024          # 64 MiB physical per TC: leave headroom
    if "v5" in kind or "v6" in kind:
        return 100 * 1024 * 1024         # 128 MiB physical
    return 64 * 1024 * 1024              # conservative default (proven on sandbox)


def _choose_block_b(B, S, D, F, kind, cdt_itemsize, out_itemsize, vmem_limit):
    """Largest legal batch block whose VMEM footprint fits the budget.

    Legal = full batch or a multiple of 8 dividing B (keeps the (S, block_b, D)
    block's second-to-last dim either a full array dim or 8-aligned).
    """
    cands = sorted({b for b in range(8, B + 1, 8) if B % b == 0} | {B})
    if "v7" in kind:
        # Prefer >= 2 "parallel" grid steps so both v7x TensorCores get work.
        two_step = [b for b in cands if B // b >= 2]
        if two_step:
            cands = two_step
    budget = int(vmem_limit * 0.75)
    # Resident weights (worst case: double-buffered by the pipeline).
    weights = (2 * D * D + 2 * D * D + 2 * D * F) * cdt_itemsize * 2

    def est(bb):
        n = bb * S
        blocks = 2 * S * bb * D * (4 + 4 + out_itemsize)     # src/pos/out, double-buffered
        acts = 10 * n * D * 4                                 # x, qk_in, q, k, v, attn, src1, ff, out, slack
        scores = 2 * bb * S * S * 4                           # ~two heads' score/prob slabs live
        ffn = n * F * (4 + cdt_itemsize)                      # f32 pre-relu + compute-dtype copy
        return blocks + acts + scores + ffn + weights

    fitting = [b for b in cands if est(b) <= budget]
    return max(fitting) if fitting else min(cands)


def transformer_encoder_layer(src, pos, params, *, nhead,
                              compute_dtype=jnp.float32,
                              out_dtype=jnp.float32,
                              block_b=None,
                              approx_recip=True):
    """src, pos: (S, B, D) float32.  Returns (S, B, D) `out_dtype`.

    compute_dtype=jnp.bfloat16 feeds the MXU with bf16 operands (f32
    accumulation; softmax / LayerNorm / residual math stays f32).  Recommended
    on v5e, v6e and v7x alike (v5e's MXU natively takes bf16 operands).
    approx_recip=False uses an exact divide in softmax (training parity).
    """
    S, B, D = src.shape
    F = params["w1"].shape[0]
    dh = D // nhead
    cdt = compute_dtype
    kind = _device_kind()
    vmem_limit = _vmem_limit_bytes(kind)
    if block_b is None:
        block_b = _choose_block_b(B, S, D, F, kind,
                                  jnp.dtype(cdt).itemsize,
                                  jnp.dtype(out_dtype).itemsize,
                                  vmem_limit)
    assert B % block_b == 0, (B, block_b)

    in_w, in_b = params["in_w"], params["in_b"]
    scale = 1.0 / math.sqrt(dh)
    # Fold the 1/sqrt(dh) scale into the q half of the fused q/k projection.
    wq = in_w[:D, :] * scale
    bq = in_b[:, :D] * scale
    # Pre-transposed / fused weights: no `.T` relayout inside the kernel.
    wqk = jnp.transpose(jnp.concatenate([wq, in_w[D:2 * D, :]], axis=0)).astype(cdt)  # (D, 2D)
    bqk = jnp.concatenate([bq, in_b[:, D:2 * D]], axis=1).astype(jnp.float32)         # (1, 2D)
    wv = jnp.transpose(in_w[2 * D:, :]).astype(cdt)          # (D, D)
    bv = in_b[:, 2 * D:].astype(jnp.float32)                 # (1, D)
    wo = jnp.transpose(params["out_w"]).astype(cdt)          # (D, D)
    bo = params["out_b"].astype(jnp.float32)                 # (1, D)
    w1 = jnp.transpose(params["w1"]).astype(cdt)             # (D, F)
    b1 = params["b1"].astype(jnp.float32)                    # (1, F)
    w2 = jnp.transpose(params["w2"]).astype(cdt)             # (F, D)
    b2 = params["b2"].astype(jnp.float32)                    # (1, D)
    n1w = params["n1w"].astype(jnp.float32)
    n1b = params["n1b"].astype(jnp.float32)
    n2w = params["n2w"].astype(jnp.float32)
    n2b = params["n2b"].astype(jnp.float32)

    # Weight blocks are fully resident with a constant index_map; Mosaic keeps
    # re-using the same block across grid steps.
    # TODO(synk): pipeline_mode=pl.Buffered(1) here would force single-buffered
    # weight allocation (frees a few MB on v7x); left off pending verification.
    def full(a):
        return pl.BlockSpec(a.shape, lambda b: (0, 0))

    tok_spec = pl.BlockSpec((S, block_b, D), lambda b: (0, b, 0))
    kernel = functools.partial(encoder_layer_kernel, nhead=nhead,
                               approx_recip=approx_recip)

    # Advisory cost estimate so XLA can schedule around the fused layer.
    n_tok = S * B
    flops = (8 * n_tok * D * D            # q/k, v, out projections
             + 4 * n_tok * D * F          # FFN
             + 4 * B * S * S * D)         # attention scores + PV
    transcendentals = B * nhead * S * S + 4 * n_tok
    bytes_accessed = (3 * n_tok * D * 4
                      + (4 * D * D + 2 * D * F) * jnp.dtype(cdt).itemsize)
    cost = pl.CostEstimate(flops=int(flops),
                           transcendentals=int(transcendentals),
                           bytes_accessed=int(bytes_accessed))

    out = pl.pallas_call(
        kernel,
        out_shape=jax.ShapeDtypeStruct((S, B, D), out_dtype),
        grid=(B // block_b,),
        in_specs=[
            tok_spec, tok_spec,
            full(wqk), full(bqk), full(wv), full(bv),
            full(wo), full(bo),
            full(w1), full(b1), full(w2), full(b2),
            full(n1w), full(n1b), full(n2w), full(n2b),
        ],
        out_specs=pl.BlockSpec((S, block_b, D), lambda b: (0, b, 0)),
        compiler_params=pltpu.CompilerParams(
            dimension_semantics=("parallel",),
            vmem_limit_bytes=vmem_limit,
        ),
        cost_estimate=cost,
    )(
        # src/pos stay f32 -> f32 residual stream & LayerNorm inputs (parity).
        src.astype(jnp.float32), pos.astype(jnp.float32),
        wqk, bqk, wv, bv, wo, bo, w1, b1, w2, b2, n1w, n1b, n2w, n2b,
    )
    return out


def reference(src, pos, params, *, nhead):
    """Pure-JAX reference matching PyTorch forward_post in eval mode."""
    S, B, D = src.shape
    dh = D // nhead
    x = src
    qk = x + pos
    W, bqkv = params["in_w"], params["in_b"][0]
    q = jnp.einsum("sbd,ed->sbe", qk, W[:D]) + bqkv[:D]
    k = jnp.einsum("sbd,ed->sbe", qk, W[D:2 * D]) + bqkv[D:2 * D]
    v = jnp.einsum("sbd,ed->sbe", x, W[2 * D:]) + bqkv[2 * D:]

    def split(t):  # (S,B,D) -> (B, nhead, S, dh)
        return jnp.transpose(t.reshape(S, B, nhead, dh), (1, 2, 0, 3))

    qh, kh, vh = split(q), split(k), split(v)
    s = jnp.einsum("bhqd,bhkd->bhqk", qh * (1.0 / math.sqrt(dh)), kh)
    a = jax.nn.softmax(s, axis=-1)
    o = jnp.einsum("bhqk,bhkd->bhqd", a, vh)
    o = jnp.transpose(o, (2, 0, 1, 3)).reshape(S, B, D)
    attn = o @ params["out_w"].T + params["out_b"][0]

    def ln(t, w, b):
        mu = jnp.mean(t, -1, keepdims=True)
        var = jnp.mean((t - mu) ** 2, -1, keepdims=True)
        return (t - mu) * jax.lax.rsqrt(var + 1e-5) * w[0] + b[0]

    src1 = ln(x + attn, params["n1w"], params["n1b"])
    ff = jnp.maximum(src1 @ params["w1"].T + params["b1"][0], 0.0) @ params["w2"].T + params["b2"][0]
    return ln(src1 + ff, params["n2w"], params["n2b"])


if __name__ == "__main__":
    S, B, D, NHEAD, DFF = 8, 2, 32, 4, 64
    key = jax.random.PRNGKey(0)
    ks = jax.random.split(key, 10)

    def u(k, shape, scale=0.1):
        return (jax.random.uniform(k, shape, jnp.float32) - 0.5) * 2 * scale

    params = {
        "in_w": u(ks[0], (3 * D, D)),
        "in_b": u(ks[1], (1, 3 * D)),
        "out_w": u(ks[2], (D, D)),
        "out_b": u(ks[3], (1, D)),
        "w1": u(ks[4], (DFF, D)),
        "b1": u(ks[5], (1, DFF)),
        "w2": u(ks[6], (D, DFF)),
        "b2": u(ks[7], (1, D)),
        "n1w": jnp.ones((1, D), jnp.float32),
        "n1b": jnp.zeros((1, D), jnp.float32),
        "n2w": jnp.ones((1, D), jnp.float32),
        "n2b": jnp.zeros((1, D), jnp.float32),
    }

    src = jax.random.normal(ks[8], (S, B, D), jnp.float32)
    pos = jax.random.normal(ks[9], (S, B, D), jnp.float32)

    ref = reference(src, pos, params, nhead=NHEAD)

    # f32 MXU path.
    out_f32 = jax.block_until_ready(
        transformer_encoder_layer(src, pos, params, nhead=NHEAD))
    assert out_f32.shape == (S, B, D)
    assert jnp.allclose(out_f32, ref, atol=5e-3, rtol=5e-3), \
        float(jnp.max(jnp.abs(out_f32 - ref)))

    # bf16 MXU path (recommended on v5e/v6e/v7x): bf16 dot operands, f32
    # accumulation, f32 residual stream / softmax / LayerNorm.
    out_bf16 = jax.block_until_ready(
        transformer_encoder_layer(src, pos, params, nhead=NHEAD,
                                  compute_dtype=jnp.bfloat16))
    assert jnp.allclose(out_bf16, ref, atol=7.5e-2, rtol=5e-2), \
        float(jnp.max(jnp.abs(out_bf16 - ref)))

    print("KERNEL_OK")
</pallas_src>

<mosaic_0001>
module attributes {stable_mosaic.version = 11 : i64} {
  func.func @encoder_layer_kernel(%arg0: i32, %arg1: memref<8x2x32xf32, #tpu.memory_space<vmem>>, %arg2: memref<8x2x32xf32, #tpu.memory_space<vmem>>, %arg3: memref<32x64xf32, #tpu.memory_space<vmem>>, %arg4: memref<1x64xf32, #tpu.memory_space<vmem>>, %arg5: memref<32x32xf32, #tpu.memory_space<vmem>>, %arg6: memref<1x32xf32, #tpu.memory_space<vmem>>, %arg7: memref<32x32xf32, #tpu.memory_space<vmem>>, %arg8: memref<1x32xf32, #tpu.memory_space<vmem>>, %arg9: memref<32x64xf32, #tpu.memory_space<vmem>>, %arg10: memref<1x64xf32, #tpu.memory_space<vmem>>, %arg11: memref<64x32xf32, #tpu.memory_space<vmem>>, %arg12: memref<1x32xf32, #tpu.memory_space<vmem>>, %arg13: memref<1x32xf32, #tpu.memory_space<vmem>>, %arg14: memref<1x32xf32, #tpu.memory_space<vmem>>, %arg15: memref<1x32xf32, #tpu.memory_space<vmem>>, %arg16: memref<1x32xf32, #tpu.memory_space<vmem>>, %arg17: memref<8x2x32xf32, #tpu.memory_space<vmem>>) attributes {dimension_semantics = [#tpu.dimension_semantics<parallel>], iteration_bounds = array<i64: 1>, scalar_prefetch = 0 : i64, scratch_operands = 0 : i64, tpu.core_type = #tpu.core_type<tc>, window_params = [{transform_indices = @transform_0, window_bounds = array<i64: 8, 2, 32>}, {transform_indices = @transform_1, window_bounds = array<i64: 8, 2, 32>}, {pipeline_mode = #tpu.pipeline_mode<synchronous>, transform_indices = @transform_2, window_bounds = array<i64: 32, 64>}, {pipeline_mode = #tpu.pipeline_mode<synchronous>, transform_indices = @transform_3, window_bounds = array<i64: 1, 64>}, {pipeline_mode = #tpu.pipeline_mode<synchronous>, transform_indices = @transform_4, window_bounds = array<i64: 32, 32>}, {pipeline_mode = #tpu.pipeline_mode<synchronous>, transform_indices = @transform_5, window_bounds = array<i64: 1, 32>}, {pipeline_mode = #tpu.pipeline_mode<synchronous>, transform_indices = @transform_6, window_bounds = array<i64: 32, 32>}, {pipeline_mode = #tpu.pipeline_mode<synchronous>, transform_indices = @transform_7, window_bounds = array<i64: 1, 32>}, {pipeline_mode = #tpu.pipeline_mode<synchronous>, transform_indices = @transform_8, window_bounds = array<i64: 32, 64>}, {pipeline_mode = #tpu.pipeline_mode<synchronous>, transform_indices = @transform_9, window_bounds = array<i64: 1, 64>}, {pipeline_mode = #tpu.pipeline_mode<synchronous>, transform_indices = @transform_10, window_bounds = array<i64: 64, 32>}, {pipeline_mode = #tpu.pipeline_mode<synchronous>, transform_indices = @transform_11, window_bounds = array<i64: 1, 32>}, {pipeline_mode = #tpu.pipeline_mode<synchronous>, transform_indices = @transform_12, window_bounds = array<i64: 1, 32>}, {pipeline_mode = #tpu.pipeline_mode<synchronous>, transform_indices = @transform_13, window_bounds = array<i64: 1, 32>}, {pipeline_mode = #tpu.pipeline_mode<synchronous>, transform_indices = @transform_14, window_bounds = array<i64: 1, 32>}, {pipeline_mode = #tpu.pipeline_mode<synchronous>, transform_indices = @transform_15, window_bounds = array<i64: 1, 32>}, {transform_indices = @transform_16, window_bounds = array<i64: 8, 2, 32>}]} {
    %c0 = arith.constant 0 : index
    %c0_0 = arith.constant 0 : index
    %c0_1 = arith.constant 0 : index
    %0 = vector.load %arg1[%c0, %c0_0, %c0_1] : memref<8x2x32xf32, #tpu.memory_space<vmem>>, vector<8x2x32xf32>
    %c0_2 = arith.constant 0 : index
    %c0_3 = arith.constant 0 : index
    %c0_4 = arith.constant 0 : index
    %1 = vector.load %arg2[%c0_2, %c0_3, %c0_4] : memref<8x2x32xf32, #tpu.memory_space<vmem>>, vector<8x2x32xf32>
    %2 = tpu.transpose %0, [1, 0, 2] : vector<8x2x32xf32> -> vector<2x8x32xf32>
    %3 = vector.shape_cast %2 : vector<2x8x32xf32> to vector<16x32xf32>
    %4 = arith.addf %0, %1 : vector<8x2x32xf32>
    %5 = tpu.transpose %4, [1, 0, 2] : vector<8x2x32xf32> -> vector<2x8x32xf32>
    %6 = vector.shape_cast %5 : vector<2x8x32xf32> to vector<16x32xf32>
    %c0_5 = arith.constant 0 : index
    %c0_6 = arith.constant 0 : index
    %7 = vector.load %arg3[%c0_5, %c0_6] : memref<32x64xf32, #tpu.memory_space<vmem>>, vector<32x64xf32>
    %cst = arith.constant dense<0.000000e+00> : vector<16x64xf32>
    %8 = tpu.matmul %6, %7, %cst {dimension_numbers = #tpu.dot_dimension_numbers<[1], [0], [0], [1], [0, 0, 1, 1], [], []>} : vector<16x32xf32>, vector<32x64xf32>, vector<16x64xf32> -> vector<16x64xf32>
    %c0_7 = arith.constant 0 : index
    %c0_8 = arith.constant 0 : index
    %9 = vector.load %arg4[%c0_7, %c0_8] : memref<1x64xf32, #tpu.memory_space<vmem>>, vector<1x64xf32>
    %10 = vector.broadcast %9 : vector<1x64xf32> to vector<16x64xf32>
    %11 = arith.addf %8, %10 : vector<16x64xf32>
    %12 = vector.extract_strided_slice %11 {offsets = [0, 0], sizes = [16, 32], strides = [1, 1]} : vector<16x64xf32> to vector<16x32xf32>
    %13 = vector.extract_strided_slice %11 {offsets = [0, 32], sizes = [16, 32], strides = [1, 1]} : vector<16x64xf32> to vector<16x32xf32>
    %c0_9 = arith.constant 0 : index
    %c0_10 = arith.constant 0 : index
    %14 = vector.load %arg5[%c0_9, %c0_10] : memref<32x32xf32, #tpu.memory_space<vmem>>, vector<32x32xf32>
    %cst_11 = arith.constant dense<0.000000e+00> : vector<16x32xf32>
    %15 = tpu.matmul %3, %14, %cst_11 {dimension_numbers = #tpu.dot_dimension_numbers<[1], [0], [0], [1], [0, 0, 1, 1], [], []>} : vector<16x32xf32>, vector<32x32xf32>, vector<16x32xf32> -> vector<16x32xf32>
    %c0_12 = arith.constant 0 : index
    %c0_13 = arith.constant 0 : index
    %16 = vector.load %arg6[%c0_12, %c0_13] : memref<1x32xf32, #tpu.memory_space<vmem>>, vector<1x32xf32>
    %17 = vector.broadcast %16 : vector<1x32xf32> to vector<16x32xf32>
    %18 = arith.addf %15, %17 : vector<16x32xf32>
    %cst_14 = arith.constant 0.000000e+00 : f32
    %19 = vector.broadcast %cst_14 : f32 to vector<16x32xf32>
    %c0_15 = arith.constant 0 : index
    %c0_16 = arith.constant 0 : index
    %20 = vector.load %arg8[%c0_15, %c0_16] : memref<1x32xf32, #tpu.memory_space<vmem>>, vector<1x32xf32>
    %21 = vector.broadcast %20 : vector<1x32xf32> to vector<16x32xf32>
    %22 = arith.addf %19, %21 : vector<16x32xf32>
    %23 = vector.extract_strided_slice %12 {offsets = [0, 0], sizes = [16, 8], strides = [1, 1]} : vector<16x32xf32> to vector<16x8xf32>
    %24 = vector.shape_cast %23 : vector<16x8xf32> to vector<2x8x8xf32>
    %25 = vector.extract_strided_slice %13 {offsets = [0, 0], sizes = [16, 8], strides = [1, 1]} : vector<16x32xf32> to vector<16x8xf32>
    %26 = vector.shape_cast %25 : vector<16x8xf32> to vector<2x8x8xf32>
    %27 = vector.extract_strided_slice %18 {offsets = [0, 0], sizes = [16, 8], strides = [1, 1]} : vector<16x32xf32> to vector<16x8xf32>
    %28 = vector.shape_cast %27 : vector<16x8xf32> to vector<2x8x8xf32>
    "tpu.trace_start"() <{level = 10 : i32, message = "bqd,bkd->bqk"}> : () -> ()
    %cst_17 = arith.constant dense<0.000000e+00> : vector<2x8x8xf32>
    %29 = tpu.matmul %24, %26, %cst_17 {dimension_numbers = #tpu.dot_dimension_numbers<[2], [2], [1], [1], [0, 0, 0, 1, 1, 1], [0], [0]>} : vector<2x8x8xf32>, vector<2x8x8xf32>, vector<2x8x8xf32> -> vector<2x8x8xf32>
    "tpu.trace_stop"() : () -> ()
    %cst_18 = arith.constant dense<0xFF800000> : vector<2x8xf32>
    %30 = vector.multi_reduction <maximumf>, %29, %cst_18 [2] : vector<2x8x8xf32> to vector<2x8xf32>
    %31 = vector.shape_cast %30 : vector<2x8xf32> to vector<2x8x1xf32>
    %32 = vector.broadcast %31 : vector<2x8x1xf32> to vector<2x8x8xf32>
    %33 = arith.subf %29, %32 : vector<2x8x8xf32>
    %34 = math.exp %33 : vector<2x8x8xf32>
    %cst_19 = arith.constant dense<0.000000e+00> : vector<2x8xf32>
    %35 = vector.multi_reduction <add>, %34, %cst_19 [2] : vector<2x8x8xf32> to vector<2x8xf32>
    %36 = vector.shape_cast %35 : vector<2x8xf32> to vector<2x8x1xf32>
    %37 = tpu.reciprocal %36 {approx = true} : vector<2x8x1xf32> -> vector<2x8x1xf32>
    %38 = vector.broadcast %37 : vector<2x8x1xf32> to vector<2x8x8xf32>
    %39 = arith.mulf %34, %38 : vector<2x8x8xf32>
    "tpu.trace_start"() <{level = 10 : i32, message = "bqk,bkd->bqd"}> : () -> ()
    %cst_20 = arith.constant dense<0.000000e+00> : vector<2x8x8xf32>
    %40 = tpu.matmul %39, %28, %cst_20 {dimension_numbers = #tpu.dot_dimension_numbers<[2], [1], [1], [2], [0, 0, 0, 1, 1, 2], [0], [0]>} : vector<2x8x8xf32>, vector<2x8x8xf32>, vector<2x8x8xf32> -> vector<2x8x8xf32>
    "tpu.trace_stop"() : () -> ()
    %41 = vector.shape_cast %40 : vector<2x8x8xf32> to vector<16x8xf32>
    %c0_21 = arith.constant 0 : index
    %c0_22 = arith.constant 0 : index
    %42 = vector.load %arg7[%c0_21, %c0_22] : memref<32x32xf32, #tpu.memory_space<vmem>>, vector<8x32xf32>
    %cst_23 = arith.constant dense<0.000000e+00> : vector<16x32xf32>
    %43 = tpu.matmul %41, %42, %cst_23 {dimension_numbers = #tpu.dot_dimension_numbers<[1], [0], [0], [1], [0, 0, 1, 1], [], []>} : vector<16x8xf32>, vector<8x32xf32>, vector<16x32xf32> -> vector<16x32xf32>
    %44 = arith.addf %22, %43 : vector<16x32xf32>
    %45 = vector.extract_strided_slice %12 {offsets = [0, 8], sizes = [16, 8], strides = [1, 1]} : vector<16x32xf32> to vector<16x8xf32>
    %46 = vector.shape_cast %45 : vector<16x8xf32> to vector<2x8x8xf32>
    %47 = vector.extract_strided_slice %13 {offsets = [0, 8], sizes = [16, 8], strides = [1, 1]} : vector<16x32xf32> to vector<16x8xf32>
    %48 = vector.shape_cast %47 : vector<16x8xf32> to vector<2x8x8xf32>
    %49 = vector.extract_strided_slice %18 {offsets = [0, 8], sizes = [16, 8], strides = [1, 1]} : vector<16x32xf32> to vector<16x8xf32>
    %50 = vector.shape_cast %49 : vector<16x8xf32> to vector<2x8x8xf32>
    "tpu.trace_start"() <{level = 10 : i32, message = "bqd,bkd->bqk"}> : () -> ()
    %cst_24 = arith.constant dense<0.000000e+00> : vector<2x8x8xf32>
    %51 = tpu.matmul %46, %48, %cst_24 {dimension_numbers = #tpu.dot_dimension_numbers<[2], [2], [1], [1], [0, 0, 0, 1, 1, 1], [0], [0]>} : vector<2x8x8xf32>, vector<2x8x8xf32>, vector<2x8x8xf32> -> vector<2x8x8xf32>
    "tpu.trace_stop"() : () -> ()
    %cst_25 = arith.constant dense<0xFF800000> : vector<2x8xf32>
    %52 = vector.multi_reduction <maximumf>, %51, %cst_25 [2] : vector<2x8x8xf32> to vector<2x8xf32>
    %53 = vector.shape_cast %52 : vector<2x8xf32> to vector<2x8x1xf32>
    %54 = vector.broadcast %53 : vector<2x8x1xf32> to vector<2x8x8xf32>
    %55 = arith.subf %51, %54 : vector<2x8x8xf32>
    %56 = math.exp %55 : vector<2x8x8xf32>
    %cst_26 = arith.constant dense<0.000000e+00> : vector<2x8xf32>
    %57 = vector.multi_reduction <add>, %56, %cst_26 [2] : vector<2x8x8xf32> to vector<2x8xf32>
    %58 = vector.shape_cast %57 : vector<2x8xf32> to vector<2x8x1xf32>
    %59 = tpu.reciprocal %58 {approx = true} : vector<2x8x1xf32> -> vector<2x8x1xf32>
    %60 = vector.broadcast %59 : vector<2x8x1xf32> to vector<2x8x8xf32>
    %61 = arith.mulf %56, %60 : vector<2x8x8xf32>
    "tpu.trace_start"() <{level = 10 : i32, message = "bqk,bkd->bqd"}> : () -> ()
    %cst_27 = arith.constant dense<0.000000e+00> : vector<2x8x8xf32>
    %62 = tpu.matmul %61, %50, %cst_27 {dimension_numbers = #tpu.dot_dimension_numbers<[2], [1], [1], [2], [0, 0, 0, 1, 1, 2], [0], [0]>} : vector<2x8x8xf32>, vector<2x8x8xf32>, vector<2x8x8xf32> -> vector<2x8x8xf32>
    "tpu.trace_stop"() : () -> ()
    %63 = vector.shape_cast %62 : vector<2x8x8xf32> to vector<16x8xf32>
    %c8 = arith.constant 8 : index
    %c0_28 = arith.constant 0 : index
    %64 = vector.load %arg7[%c8, %c0_28] : memref<32x32xf32, #tpu.memory_space<vmem>>, vector<8x32xf32>
    %cst_29 = arith.constant dense<0.000000e+00> : vector<16x32xf32>
    %65 = tpu.matmul %63, %64, %cst_29 {dimension_numbers = #tpu.dot_dimension_numbers<[1], [0], [0], [1], [0, 0, 1, 1], [], []>} : vector<16x8xf32>, vector<8x32xf32>, vector<16x32xf32> -> vector<16x32xf32>
    %66 = arith.addf %44, %65 : vector<16x32xf32>
    %67 = vector.extract_strided_slice %12 {offsets = [0, 16], sizes = [16, 8], strides = [1, 1]} : vector<16x32xf32> to vector<16x8xf32>
    %68 = vector.shape_cast %67 : vector<16x8xf32> to vector<2x8x8xf32>
    %69 = vector.extract_strided_slice %13 {offsets = [0, 16], sizes = [16, 8], strides = [1, 1]} : vector<16x32xf32> to vector<16x8xf32>
    %70 = vector.shape_cast %69 : vector<16x8xf32> to vector<2x8x8xf32>
    %71 = vector.extract_strided_slice %18 {offsets = [0, 16], sizes = [16, 8], strides = [1, 1]} : vector<16x32xf32> to vector<16x8xf32>
    %72 = vector.shape_cast %71 : vector<16x8xf32> to vector<2x8x8xf32>
    "tpu.trace_start"() <{level = 10 : i32, message = "bqd,bkd->bqk"}> : () -> ()
    %cst_30 = arith.constant dense<0.000000e+00> : vector<2x8x8xf32>
    %73 = tpu.matmul %68, %70, %cst_30 {dimension_numbers = #tpu.dot_dimension_numbers<[2], [2], [1], [1], [0, 0, 0, 1, 1, 1], [0], [0]>} : vector<2x8x8xf32>, vector<2x8x8xf32>, vector<2x8x8xf32> -> vector<2x8x8xf32>
    "tpu.trace_stop"() : () -> ()
    %cst_31 = arith.constant dense<0xFF800000> : vector<2x8xf32>
    %74 = vector.multi_reduction <maximumf>, %73, %cst_31 [2] : vector<2x8x8xf32> to vector<2x8xf32>
    %75 = vector.shape_cast %74 : vector<2x8xf32> to vector<2x8x1xf32>
    %76 = vector.broadcast %75 : vector<2x8x1xf32> to vector<2x8x8xf32>
    %77 = arith.subf %73, %76 : vector<2x8x8xf32>
    %78 = math.exp %77 : vector<2x8x8xf32>
    %cst_32 = arith.constant dense<0.000000e+00> : vector<2x8xf32>
    %79 = vector.multi_reduction <add>, %78, %cst_32 [2] : vector<2x8x8xf32> to vector<2x8xf32>
    %80 = vector.shape_cast %79 : vector<2x8xf32> to vector<2x8x1xf32>
    %81 = tpu.reciprocal %80 {approx = true} : vector<2x8x1xf32> -> vector<2x8x1xf32>
    %82 = vector.broadcast %81 : vector<2x8x1xf32> to vector<2x8x8xf32>
    %83 = arith.mulf %78, %82 : vector<2x8x8xf32>
    "tpu.trace_start"() <{level = 10 : i32, message = "bqk,bkd->bqd"}> : () -> ()
    %cst_33 = arith.constant dense<0.000000e+00> : vector<2x8x8xf32>
    %84 = tpu.matmul %83, %72, %cst_33 {dimension_numbers = #tpu.dot_dimension_numbers<[2], [1], [1], [2], [0, 0, 0, 1, 1, 2], [0], [0]>} : vector<2x8x8xf32>, vector<2x8x8xf32>, vector<2x8x8xf32> -> vector<2x8x8xf32>
    "tpu.trace_stop"() : () -> ()
    %85 = vector.shape_cast %84 : vector<2x8x8xf32> to vector<16x8xf32>
    %c16 = arith.constant 16 : index
    %c0_34 = arith.constant 0 : index
    %86 = vector.load %arg7[%c16, %c0_34] : memref<32x32xf32, #tpu.memory_space<vmem>>, vector<8x32xf32>
    %cst_35 = arith.constant dense<0.000000e+00> : vector<16x32xf32>
    %87 = tpu.matmul %85, %86, %cst_35 {dimension_numbers = #tpu.dot_dimension_numbers<[1], [0], [0], [1], [0, 0, 1, 1], [], []>} : vector<16x8xf32>, vector<8x32xf32>, vector<16x32xf32> -> vector<16x32xf32>
    %88 = arith.addf %66, %87 : vector<16x32xf32>
    %89 = vector.extract_strided_slice %12 {offsets = [0, 24], sizes = [16, 8], strides = [1, 1]} : vector<16x32xf32> to vector<16x8xf32>
    %90 = vector.shape_cast %89 : vector<16x8xf32> to vector<2x8x8xf32>
    %91 = vector.extract_strided_slice %13 {offsets = [0, 24], sizes = [16, 8], strides = [1, 1]} : vector<16x32xf32> to vector<16x8xf32>
    %92 = vector.shape_cast %91 : vector<16x8xf32> to vector<2x8x8xf32>
    %93 = vector.extract_strided_slice %18 {offsets = [0, 24], sizes = [16, 8], strides = [1, 1]} : vector<16x32xf32> to vector<16x8xf32>
    %94 = vector.shape_cast %93 : vector<16x8xf32> to vector<2x8x8xf32>
    "tpu.trace_start"() <{level = 10 : i32, message = "bqd,bkd->bqk"}> : () -> ()
    %cst_36 = arith.constant dense<0.000000e+00> : vector<2x8x8xf32>
    %95 = tpu.matmul %90, %92, %cst_36 {dimension_numbers = #tpu.dot_dimension_numbers<[2], [2], [1], [1], [0, 0, 0, 1, 1, 1], [0], [0]>} : vector<2x8x8xf32>, vector<2x8x8xf32>, vector<2x8x8xf32> -> vector<2x8x8xf32>
    "tpu.trace_stop"() : () -> ()
    %cst_37 = arith.constant dense<0xFF800000> : vector<2x8xf32>
    %96 = vector.multi_reduction <maximumf>, %95, %cst_37 [2] : vector<2x8x8xf32> to vector<2x8xf32>
    %97 = vector.shape_cast %96 : vector<2x8xf32> to vector<2x8x1xf32>
    %98 = vector.broadcast %97 : vector<2x8x1xf32> to vector<2x8x8xf32>
    %99 = arith.subf %95, %98 : vector<2x8x8xf32>
    %100 = math.exp %99 : vector<2x8x8xf32>
    %cst_38 = arith.constant dense<0.000000e+00> : vector<2x8xf32>
    %101 = vector.multi_reduction <add>, %100, %cst_38 [2] : vector<2x8x8xf32> to vector<2x8xf32>
    %102 = vector.shape_cast %101 : vector<2x8xf32> to vector<2x8x1xf32>
    %103 = tpu.reciprocal %102 {approx = true} : vector<2x8x1xf32> -> vector<2x8x1xf32>
    %104 = vector.broadcast %103 : vector<2x8x1xf32> to vector<2x8x8xf32>
    %105 = arith.mulf %100, %104 : vector<2x8x8xf32>
    "tpu.trace_start"() <{level = 10 : i32, message = "bqk,bkd->bqd"}> : () -> ()
    %cst_39 = arith.constant dense<0.000000e+00> : vector<2x8x8xf32>
    %106 = tpu.matmul %105, %94, %cst_39 {dimension_numbers = #tpu.dot_dimension_numbers<[2], [1], [1], [2], [0, 0, 0, 1, 1, 2], [0], [0]>} : vector<2x8x8xf32>, vector<2x8x8xf32>, vector<2x8x8xf32> -> vector<2x8x8xf32>
    "tpu.trace_stop"() : () -> ()
    %107 = vector.shape_cast %106 : vector<2x8x8xf32> to vector<16x8xf32>
    %c24 = arith.constant 24 : index
    %c0_40 = arith.constant 0 : index
    %108 = vector.load %arg7[%c24, %c0_40] : memref<32x32xf32, #tpu.memory_space<vmem>>, vector<8x32xf32>
    %cst_41 = arith.constant dense<0.000000e+00> : vector<16x32xf32>
    %109 = tpu.matmul %107, %108, %cst_41 {dimension_numbers = #tpu.dot_dimension_numbers<[1], [0], [0], [1], [0, 0, 1, 1], [], []>} : vector<16x8xf32>, vector<8x32xf32>, vector<16x32xf32> -> vector<16x32xf32>
    %110 = arith.addf %88, %109 : vector<16x32xf32>
    %111 = arith.addf %3, %110 : vector<16x32xf32>
    %c0_42 = arith.constant 0 : index
    %c0_43 = arith.constant 0 : index
    %112 = vector.load %arg13[%c0_42, %c0_43] : memref<1x32xf32, #tpu.memory_space<vmem>>, vector<1x32xf32>
    %c0_44 = arith.constant 0 : index
    %c0_45 = arith.constant 0 : index
    %113 = vector.load %arg14[%c0_44, %c0_45] : memref<1x32xf32, #tpu.memory_space<vmem>>, vector<1x32xf32>
    %cst_46 = arith.constant dense<0.000000e+00> : vector<16xf32>
    %114 = vector.multi_reduction <add>, %111, %cst_46 [1] : vector<16x32xf32> to vector<16xf32>
    %115 = vector.shape_cast %114 : vector<16xf32> to vector<16x1xf32>
    %cst_47 = arith.constant 3.200000e+01 : f32
    %116 = vector.broadcast %cst_47 : f32 to vector<16x1xf32>
    %117 = arith.divf %115, %116 : vector<16x1xf32>
    %118 = vector.broadcast %117 : vector<16x1xf32> to vector<16x32xf32>
    %119 = arith.subf %111, %118 : vector<16x32xf32>
    %120 = arith.mulf %119, %119 : vector<16x32xf32>
    %cst_48 = arith.constant dense<0.000000e+00> : vector<16xf32>
    %121 = vector.multi_reduction <add>, %120, %cst_48 [1] : vector<16x32xf32> to vector<16xf32>
    %122 = vector.shape_cast %121 : vector<16xf32> to vector<16x1xf32>
    %cst_49 = arith.constant 3.200000e+01 : f32
    %123 = vector.broadcast %cst_49 : f32 to vector<16x1xf32>
    %124 = arith.divf %122, %123 : vector<16x1xf32>
    %125 = vector.broadcast %117 : vector<16x1xf32> to vector<16x32xf32>
    %126 = arith.subf %111, %125 : vector<16x32xf32>
    %cst_50 = arith.constant 9.99999974E-6 : f32
    %127 = vector.broadcast %cst_50 : f32 to vector<16x1xf32>
    %128 = arith.addf %124, %127 : vector<16x1xf32>
    %129 = math.rsqrt %128 : vector<16x1xf32>
    %130 = vector.broadcast %129 : vector<16x1xf32> to vector<16x32xf32>
    %131 = arith.mulf %126, %130 : vector<16x32xf32>
    %132 = vector.broadcast %112 : vector<1x32xf32> to vector<16x32xf32>
    %133 = arith.mulf %131, %132 : vector<16x32xf32>
    %134 = vector.broadcast %113 : vector<1x32xf32> to vector<16x32xf32>
    %135 = arith.addf %133, %134 : vector<16x32xf32>
    %c0_51 = arith.constant 0 : index
    %c0_52 = arith.constant 0 : index
    %136 = vector.load %arg9[%c0_51, %c0_52] : memref<32x64xf32, #tpu.memory_space<vmem>>, vector<32x64xf32>
    %cst_53 = arith.constant dense<0.000000e+00> : vector<16x64xf32>
    %137 = tpu.matmul %135, %136, %cst_53 {dimension_numbers = #tpu.dot_dimension_numbers<[1], [0], [0], [1], [0, 0, 1, 1], [], []>} : vector<16x32xf32>, vector<32x64xf32>, vector<16x64xf32> -> vector<16x64xf32>
    %c0_54 = arith.constant 0 : index
    %c0_55 = arith.constant 0 : index
    %138 = vector.load %arg10[%c0_54, %c0_55] : memref<1x64xf32, #tpu.memory_space<vmem>>, vector<1x64xf32>
    %139 = vector.broadcast %138 : vector<1x64xf32> to vector<16x64xf32>
    %140 = arith.addf %137, %139 : vector<16x64xf32>
    %cst_56 = arith.constant 0.000000e+00 : f32
    %141 = vector.broadcast %cst_56 : f32 to vector<16x64xf32>
    %142 = arith.maximumf %140, %141 : vector<16x64xf32>
    %c0_57 = arith.constant 0 : index
    %c0_58 = arith.constant 0 : index
    %143 = vector.load %arg11[%c0_57, %c0_58] : memref<64x32xf32, #tpu.memory_space<vmem>>, vector<64x32xf32>
    %cst_59 = arith.constant dense<0.000000e+00> : vector<16x32xf32>
    %144 = tpu.matmul %142, %143, %cst_59 {dimension_numbers = #tpu.dot_dimension_numbers<[1], [0], [0], [1], [0, 0, 1, 1], [], []>} : vector<16x64xf32>, vector<64x32xf32>, vector<16x32xf32> -> vector<16x32xf32>
    %c0_60 = arith.constant 0 : index
    %c0_61 = arith.constant 0 : index
    %145 = vector.load %arg12[%c0_60, %c0_61] : memref<1x32xf32, #tpu.memory_space<vmem>>, vector<1x32xf32>
    %146 = vector.broadcast %145 : vector<1x32xf32> to vector<16x32xf32>
    %147 = arith.addf %144, %146 : vector<16x32xf32>
    %148 = arith.addf %135, %147 : vector<16x32xf32>
    %c0_62 = arith.constant 0 : index
    %c0_63 = arith.constant 0 : index
    %149 = vector.load %arg15[%c0_62, %c0_63] : memref<1x32xf32, #tpu.memory_space<vmem>>, vector<1x32xf32>
    %c0_64 = arith.constant 0 : index
    %c0_65 = arith.constant 0 : index
    %150 = vector.load %arg16[%c0_64, %c0_65] : memref<1x32xf32, #tpu.memory_space<vmem>>, vector<1x32xf32>
    %cst_66 = arith.constant dense<0.000000e+00> : vector<16xf32>
    %151 = vector.multi_reduction <add>, %148, %cst_66 [1] : vector<16x32xf32> to vector<16xf32>
    %152 = vector.shape_cast %151 : vector<16xf32> to vector<16x1xf32>
    %cst_67 = arith.constant 3.200000e+01 : f32
    %153 = vector.broadcast %cst_67 : f32 to vector<16x1xf32>
    %154 = arith.divf %152, %153 : vector<16x1xf32>
    %155 = vector.broadcast %154 : vector<16x1xf32> to vector<16x32xf32>
    %156 = arith.subf %148, %155 : vector<16x32xf32>
    %157 = arith.mulf %156, %156 : vector<16x32xf32>
    %cst_68 = arith.constant dense<0.000000e+00> : vector<16xf32>
    %158 = vector.multi_reduction <add>, %157, %cst_68 [1] : vector<16x32xf32> to vector<16xf32>
    %159 = vector.shape_cast %158 : vector<16xf32> to vector<16x1xf32>
    %cst_69 = arith.constant 3.200000e+01 : f32
    %160 = vector.broadcast %cst_69 : f32 to vector<16x1xf32>
    %161 = arith.divf %159, %160 : vector<16x1xf32>
    %162 = vector.broadcast %154 : vector<16x1xf32> to vector<16x32xf32>
    %163 = arith.subf %148, %162 : vector<16x32xf32>
    %cst_70 = arith.constant 9.99999974E-6 : f32
    %164 = vector.broadcast %cst_70 : f32 to vector<16x1xf32>
    %165 = arith.addf %161, %164 : vector<16x1xf32>
    %166 = math.rsqrt %165 : vector<16x1xf32>
    %167 = vector.broadcast %166 : vector<16x1xf32> to vector<16x32xf32>
    %168 = arith.mulf %163, %167 : vector<16x32xf32>
    %169 = vector.broadcast %149 : vector<1x32xf32> to vector<16x32xf32>
    %170 = arith.mulf %168, %169 : vector<16x32xf32>
    %171 = vector.broadcast %150 : vector<1x32xf32> to vector<16x32xf32>
    %172 = arith.addf %170, %171 : vector<16x32xf32>
    %173 = vector.shape_cast %172 : vector<16x32xf32> to vector<2x8x32xf32>
    %174 = tpu.transpose %173, [1, 0, 2] : vector<2x8x32xf32> -> vector<8x2x32xf32>
    %c0_71 = arith.constant 0 : index
    %c0_72 = arith.constant 0 : index
    %c0_73 = arith.constant 0 : index
    %175 = vector.load %arg17[%c0_71, %c0_72, %c0_73] : memref<8x2x32xf32, #tpu.memory_space<vmem>>, vector<8x2x32xf32>
    tpu.vector_store %arg17[%c0_71, %c0_72, %c0_73], %174 {strides = array<i32>} : memref<8x2x32xf32, #tpu.memory_space<vmem>>, vector<8x2x32xf32>,
    return
  }
  func.func @transform_0(%arg0: i32) -> (i32, i32, i32) {
    %c0_i32 = arith.constant 0 : i32
    %c0_i32_0 = arith.constant 0 : i32
    %c0_i32_1 = arith.constant 0 : i32
    return %c0_i32, %arg0, %c0_i32_0 : i32, i32, i32
  }
  func.func @transform_1(%arg0: i32) -> (i32, i32, i32) {
    %c0_i32 = arith.constant 0 : i32
    %c0_i32_0 = arith.constant 0 : i32
    %c0_i32_1 = arith.constant 0 : i32
    return %c0_i32, %arg0, %c0_i32_0 : i32, i32, i32
  }
  func.func @transform_2(%arg0: i32) -> (i32, i32) {
    %c0_i32 = arith.constant 0 : i32
    %c0_i32_0 = arith.constant 0 : i32
    %c0_i32_1 = arith.constant 0 : i32
    return %c0_i32, %c0_i32_0 : i32, i32
  }
  func.func @transform_3(%arg0: i32) -> (i32, i32) {
    %c0_i32 = arith.constant 0 : i32
    %c0_i32_0 = arith.constant 0 : i32
    %c0_i32_1 = arith.constant 0 : i32
    return %c0_i32, %c0_i32_0 : i32, i32
  }
  func.func @transform_4(%arg0: i32) -> (i32, i32) {
    %c0_i32 = arith.constant 0 : i32
    %c0_i32_0 = arith.constant 0 : i32
    %c0_i32_1 = arith.constant 0 : i32
    return %c0_i32, %c0_i32_0 : i32, i32
  }
  func.func @transform_5(%arg0: i32) -> (i32, i32) {
    %c0_i32 = arith.constant 0 : i32
    %c0_i32_0 = arith.constant 0 : i32
    %c0_i32_1 = arith.constant 0 : i32
    return %c0_i32, %c0_i32_0 : i32, i32
  }
  func.func @transform_6(%arg0: i32) -> (i32, i32) {
    %c0_i32 = arith.constant 0 : i32
    %c0_i32_0 = arith.constant 0 : i32
    %c0_i32_1 = arith.constant 0 : i32
    return %c0_i32, %c0_i32_0 : i32, i32
  }
  func.func @transform_7(%arg0: i32) -> (i32, i32) {
    %c0_i32 = arith.constant 0 : i32
    %c0_i32_0 = arith.constant 0 : i32
    %c0_i32_1 = arith.constant 0 : i32
    return %c0_i32, %c0_i32_0 : i32, i32
  }
  func.func @transform_8(%arg0: i32) -> (i32, i32) {
    %c0_i32 = arith.constant 0 : i32
    %c0_i32_0 = arith.constant 0 : i32
    %c0_i32_1 = arith.constant 0 : i32
    return %c0_i32, %c0_i32_0 : i32, i32
  }
  func.func @transform_9(%arg0: i32) -> (i32, i32) {
    %c0_i32 = arith.constant 0 : i32
    %c0_i32_0 = arith.constant 0 : i32
    %c0_i32_1 = arith.constant 0 : i32
    return %c0_i32, %c0_i32_0 : i32, i32
  }
  func.func @transform_10(%arg0: i32) -> (i32, i32) {
    %c0_i32 = arith.constant 0 : i32
    %c0_i32_0 = arith.constant 0 : i32
    %c0_i32_1 = arith.constant 0 : i32
    return %c0_i32, %c0_i32_0 : i32, i32
  }
  func.func @transform_11(%arg0: i32) -> (i32, i32) {
    %c0_i32 = arith.constant 0 : i32
    %c0_i32_0 = arith.constant 0 : i32
    %c0_i32_1 = arith.constant 0 : i32
    return %c0_i32, %c0_i32_0 : i32, i32
  }
  func.func @transform_12(%arg0: i32) -> (i32, i32) {
    %c0_i32 = arith.constant 0 : i32
    %c0_i32_0 = arith.constant 0 : i32
    %c0_i32_1 = arith.constant 0 : i32
    return %c0_i32, %c0_i32_0 : i32, i32
  }
  func.func @transform_13(%arg0: i32) -> (i32, i32) {
    %c0_i32 = arith.constant 0 : i32
    %c0_i32_0 = arith.constant 0 : i32
    %c0_i32_1 = arith.constant 0 : i32
    return %c0_i32, %c0_i32_0 : i32, i32
  }
  func.func @transform_14(%arg0: i32) -> (i32, i32) {
    %c0_i32 = arith.constant 0 : i32
    %c0_i32_0 = arith.constant 0 : i32
    %c0_i32_1 = arith.constant 0 : i32
    return %c0_i32, %c0_i32_0 : i32, i32
  }
  func.func @transform_15(%arg0: i32) -> (i32, i32) {
    %c0_i32 = arith.constant 0 : i32
    %c0_i32_0 = arith.constant 0 : i32
    %c0_i32_1 = arith.constant 0 : i32
    return %c0_i32, %c0_i32_0 : i32, i32
  }
  func.func @transform_16(%arg0: i32) -> (i32, i32, i32) {
    %c0_i32 = arith.constant 0 : i32
    %c0_i32_0 = arith.constant 0 : i32
    %c0_i32_1 = arith.constant 0 : i32
    return %c0_i32, %arg0, %c0_i32_0 : i32, i32, i32
  }
}

</mosaic_0001>

<bundles_post_ra>
// kernel: tpu_custom_call.1
= control target key start
LH: loop header
LB: loop body
LE: loop exit
PB: predicated region body
PF: predicated region fallthrough
CT: control target
= control target key end

     0   :  { %s3980_s0 = inlined_call_operand.hbm [shape: f32[8,2,32], index: 0, kind: input, shape index: {}]   ;;  %s3981_s1 = inlined_call_operand.hbm [shape: f32[8,2,32], index: 1, kind: input, shape index: {}]   ;;  %s3982_s2 = inlined_call_operand.hbm [shape: f32[32,64], index: 2, kind: input, shape index: {}]   ;;  %s3983_s3 = inlined_call_operand.hbm [shape: f32[1,64], index: 3, kind: input, shape index: {}]   ;;  %s3984_s4 = inlined_call_operand.hbm [shape: f32[32,32], index: 4, kind: input, shape index: {}]   ;;  %s3985_s5 = inlined_call_operand.hbm [shape: f32[1,32], index: 5, kind: input, shape index: {}]   ;;  %s3986_s6 = inlined_call_operand.hbm [shape: f32[32,32], index: 6, kind: input, shape index: {}]   ;;  %s3987_s7 = inlined_call_operand.hbm [shape: f32[1,32], index: 7, kind: input, shape index: {}]   ;;  %s3988_s8 = inlined_call_operand.hbm [shape: f32[32,64], index: 8, kind: input, shape index: {}]   ;;  %s3989_s9 = inlined_call_operand.hbm [shape: f32[1,64], index: 9, kind: input, shape index: {}]   ;;  %s3990_s10 = inlined_call_operand.hbm [shape: f32[64,32], index: 10, kind: input, shape index: {}]   ;;  %s3991_s11 = inlined_call_operand.hbm [shape: f32[1,32], index: 11, kind: input, shape index: {}]   ;;  %s3992_s12 = inlined_call_operand.hbm [shape: f32[1,32], index: 12, kind: input, shape index: {}]   ;;  %s3993_s13 = inlined_call_operand.hbm [shape: f32[1,32], index: 13, kind: input, shape index: {}]   ;;  %s3994_s14 = inlined_call_operand.hbm [shape: f32[1,32], index: 14, kind: input, shape index: {}]   ;;  %s3995_s15 = inlined_call_operand.hbm [shape: f32[1,32], index: 15, kind: input, shape index: {}]   ;;  %s3996_s16 = inlined_call_operand.hbm [shape: f32[8,2,32], index: 16, kind: output, shape index: {}]  }
   0x1   :  { %3998 = sst [smem:[#allocation39_spill]] %s3980_s0 }
   0x2   :  { %21 = vsyncpa [#allocation3], 0 }
   0x3   :  { %22 = vsyncpa [#allocation6], 0 }
   0x4   :  { %23 = vsyncpa [#allocation9], 0 }
   0x5   :  { %24 = vsyncpa [#allocation12], 0 }
   0x6   :  { %25 = vsyncpa [#allocation15], 0 }
   0x7   :  { %26 = vsyncpa [#allocation18], 0 }
   0x8   :  { %27 = vsyncpa [#allocation21], 0 }
   0x9   :  { %28 = vsyncpa [#allocation24], 0 }
   0xa   :  { %29 = vsyncpa [#allocation27], 0 }
   0xb   :  { %30 = vsyncpa [#allocation4], 0  ;;  %s3396_s21 = smov [#allocation5]   ;;  %s3397_s23 = smov [#allocation8]  }
   0xc   :  { %s48_s22 = sshll.u32 %s3396_s21, 4  ;;  %s73_s24 = sshll.u32 %s3397_s23, 4  ;;  %s49_s22 = int_to_ptr.vmem [resolvable:$true] %s48_s22  ;;  %s3513_s24 = int_to_ptr.vmem [resolvable:$true] %s73_s24 }
   0xd   :  { %s3002_s27 = scalar_lea.hbm %s3981_s1, 256 }
   0xe   :  { %p3003_p0 = scmp.ne.s32.totalorder %s3981_s1, %s3002_s27  ;;  %p3006_p1 = scmp.lt.u32.totalorder %s3002_s27, %s3981_s1 }
  0x10   :  { %p3008_p2 = pnand %p3006_p1, %p3003_p0 }
  0x12   :  { %3011 = shalt.err (!%p3008_p2)
}
  0x13   :  { %s3012_s17 = scalar_lea.vmem %s49_s22, 256  ;;  %p3017_p4 = scmp.lt.s32.totalorder %s49_s22, %s49_s22 }
  0x14   :  { %p3013_p3 = scmp.ne.s32.totalorder %s49_s22, %s3012_s17  ;;  %p3018_p5 = scmp.lt.s32.totalorder %s3012_s17, %s3012_s17 }
  0x16   :  { %p3019_p6 = por %p3018_p5, %p3017_p4 }
  0x18   :  { %p3020_p7 = pnand %p3019_p6, %p3013_p3 }
  0x1a   :  { %3023 = shalt.err (!%p3020_p7)
}
  0x1b   :  { %s3398_s18 = smov 32   ;;  %s3399_s19 = smov 2  }
  0x1c   :  { %54 = dma.hbm_to_vmem [thread:$0]  %s3981_s1, 256, %s49_s22, [#allocation6], %s3398_s18, %s3398_s18, %s3399_s19  }
  0x1d   :  { %s3024_s26 = scalar_lea.hbm %s3983_s3, 16 }
  0x1e   :  { %p3025_p8 = scmp.ne.s32.totalorder %s3983_s3, %s3024_s26  ;;  %p3028_p9 = scmp.lt.u32.totalorder %s3024_s26, %s3983_s3 }
  0x20   :  { %p3030_p10 = pnand %p3028_p9, %p3025_p8 }
  0x22   :  { %3033 = shalt.err (!%p3030_p10)
}
  0x23   :  { %s3034_s0 = scalar_lea.vmem %s3513_s24, 16  ;;  %s3038_s1 = scalar_lea.vmem %s3513_s24, 32 }
  0x24   :  { %p3035_p11 = scmp.ne.s32.totalorder %s3513_s24, %s3034_s0  ;;  %p3039_p12 = scmp.lt.s32.totalorder %s3513_s24, %s3513_s24 }
  0x25   :  { %p3040_p13 = scmp.lt.s32.totalorder %s3038_s1, %s3034_s0 }
  0x27   :  { %p3041_p0 = por %p3040_p13, %p3039_p12 }
  0x29   :  { %p3042_p1 = pnand %p3041_p0, %p3035_p11 }
  0x2b   :  { %3045 = shalt.err (!%p3042_p1)
}
  0x2c   :  { %76 = dma.hbm_to_vmem [thread:$0]  %s3983_s3, 16, %s3513_s24, [#allocation9]  }
  0x2d   :  { %s3400_s20 = smov [#allocation11]   ;;  %s3401_s23 = smov [#allocation14]  }
  0x2e   :  { %s95_s21 = sshll.u32 %s3400_s20, 4  ;;  %s117_s25 = sshll.u32 %s3401_s23, 4  ;;  %s96_s21 = int_to_ptr.vmem [resolvable:$true] %s95_s21  ;;  %s118_s25 = int_to_ptr.vmem [resolvable:$true] %s117_s25 }
  0x2f   :  { %s3046_s28 = scalar_lea.hbm %s3985_s5, 16 }
  0x30   :  { %p3047_p2 = scmp.ne.s32.totalorder %s3985_s5, %s3046_s28  ;;  %p3050_p3 = scmp.lt.u32.totalorder %s3046_s28, %s3985_s5 }
  0x32   :  { %p3052_p4 = pnand %p3050_p3, %p3047_p2 }
  0x34   :  { %3055 = shalt.err (!%p3052_p4)
}
  0x35   :  { %s3056_s3 = scalar_lea.vmem %s96_s21, 16  ;;  %s3060_s24 = scalar_lea.vmem %s96_s21, 32 }
  0x36   :  { %p3057_p5 = scmp.ne.s32.totalorder %s96_s21, %s3056_s3  ;;  %p3061_p6 = scmp.lt.s32.totalorder %s96_s21, %s96_s21 }
  0x37   :  { %p3062_p7 = scmp.lt.s32.totalorder %s3060_s24, %s3056_s3 }
  0x39   :  { %p3063_p8 = por %p3062_p7, %p3061_p6 }
  0x3b   :  { %p3064_p9 = pnand %p3063_p8, %p3057_p5 }
  0x3d   :  { %3067 = shalt.err (!%p3064_p9)
}
  0x3e   :  { %98 = dma.hbm_to_vmem [thread:$0]  %s3985_s5, 16, %s96_s21, [#allocation12]  }
  0x3f   :  { %s3068_s26 = scalar_lea.hbm %s3987_s7, 16 }
  0x40   :  { %p3069_p10 = scmp.ne.s32.totalorder %s3987_s7, %s3068_s26  ;;  %p3072_p11 = scmp.lt.u32.totalorder %s3068_s26, %s3987_s7 }
  0x42   :  { %p3074_p12 = pnand %p3072_p11, %p3069_p10 }
  0x44   :  { %3077 = shalt.err (!%p3074_p12)
}
  0x45   :  { %s3078_s0 = scalar_lea.vmem %s118_s25, 16  ;;  %s3082_s1 = scalar_lea.vmem %s118_s25, 32 }
  0x46   :  { %p3079_p13 = scmp.ne.s32.totalorder %s118_s25, %s3078_s0  ;;  %p3083_p0 = scmp.lt.s32.totalorder %s118_s25, %s118_s25 }
  0x47   :  { %p3084_p1 = scmp.lt.s32.totalorder %s3082_s1, %s3078_s0 }
  0x49   :  { %p3085_p2 = por %p3084_p1, %p3083_p0 }
  0x4b   :  { %p3086_p3 = pnand %p3085_p2, %p3079_p13 }
  0x4d   :  { %3089 = shalt.err (!%p3086_p3)
}
  0x4e   :  { %120 = dma.hbm_to_vmem [thread:$0]  %s3987_s7, 16, %s118_s25, [#allocation15]  }
  0x4f   :  { %s3402_s3 = smov [#allocation17]   ;;  %s3403_s22 = smov [#allocation20]  }
  0x50   :  { %s139_s24 = sshll.u32 %s3402_s3, 4  ;;  %s161_s17 = sshll.u32 %s3403_s22, 4  ;;  %s140_s24 = int_to_ptr.vmem [resolvable:$true] %s139_s24  ;;  %s162_s17 = int_to_ptr.vmem [resolvable:$true] %s161_s17 }
  0x51   :  { %s3090_s26 = scalar_lea.hbm %s3989_s9, 16 }
  0x52   :  { %p3091_p4 = scmp.ne.s32.totalorder %s3989_s9, %s3090_s26  ;;  %p3094_p5 = scmp.lt.u32.totalorder %s3090_s26, %s3989_s9 }
  0x54   :  { %p3096_p6 = pnand %p3094_p5, %p3091_p4 }
  0x56   :  { %3099 = shalt.err (!%p3096_p6)
}
  0x57   :  { %s3100_s7 = scalar_lea.vmem %s140_s24, 16  ;;  %s3104_s25 = scalar_lea.vmem %s140_s24, 32 }
  0x58   :  { %p3101_p7 = scmp.ne.s32.totalorder %s140_s24, %s3100_s7  ;;  %p3105_p8 = scmp.lt.s32.totalorder %s140_s24, %s140_s24 }
  0x59   :  { %p3106_p9 = scmp.lt.s32.totalorder %s3104_s25, %s3100_s7 }
  0x5b   :  { %p3107_p10 = por %p3106_p9, %p3105_p8 }
  0x5d   :  { %p3108_p11 = pnand %p3107_p10, %p3101_p7 }
  0x5f   :  { %3111 = shalt.err (!%p3108_p11)
}
  0x60   :  { %142 = dma.hbm_to_vmem [thread:$0]  %s3989_s9, 16, %s140_s24, [#allocation18]  }
  0x61   :  { %s3112_s3 = scalar_lea.hbm %s3991_s11, 16 }
  0x62   :  { %p3113_p12 = scmp.ne.s32.totalorder %s3991_s11, %s3112_s3  ;;  %p3116_p13 = scmp.lt.u32.totalorder %s3112_s3, %s3991_s11 }
  0x64   :  { %p3118_p0 = pnand %p3116_p13, %p3113_p12 }
  0x66   :  { %3121 = shalt.err (!%p3118_p0)
}
  0x67   :  { %s3122_s27 = scalar_lea.vmem %s162_s17, 16  ;;  %s3126_s28 = scalar_lea.vmem %s162_s17, 32 }
  0x68   :  { %p3123_p1 = scmp.ne.s32.totalorder %s162_s17, %s3122_s27  ;;  %p3127_p2 = scmp.lt.s32.totalorder %s162_s17, %s162_s17 }
  0x69   :  { %p3128_p3 = scmp.lt.s32.totalorder %s3126_s28, %s3122_s27 }
  0x6b   :  { %p3129_p4 = por %p3128_p3, %p3127_p2 }
  0x6d   :  { %p3130_p5 = pnand %p3129_p4, %p3123_p1 }
  0x6f   :  { %3133 = shalt.err (!%p3130_p5)
}
  0x70   :  { %164 = dma.hbm_to_vmem [thread:$0]  %s3991_s11, 16, %s162_s17, [#allocation21]  }
  0x71   :  { %s3404_s29 = smov [#allocation23]   ;;  %s3405_s7 = smov [#allocation2]  }
  0x72   :  { %s181_s30 = sshll.u32 %s3404_s29, 4  ;;  %s36_s25 = sshll.u32 %s3405_s7, 4  ;;  %s182_s30 = int_to_ptr.vmem [resolvable:$true] %s181_s30  ;;  %s3596_s25 = int_to_ptr.vmem [resolvable:$true] %s36_s25 }
  0x73   :  { %s3134_s5 = scalar_lea.hbm %s3993_s13, 16 }
  0x74   :  { %p3135_p6 = scmp.ne.s32.totalorder %s3993_s13, %s3134_s5  ;;  %p3138_p7 = scmp.lt.u32.totalorder %s3134_s5, %s3993_s13 }
  0x76   :  { %p3140_p8 = pnand %p3138_p7, %p3135_p6 }
  0x78   :  { %3143 = shalt.err (!%p3140_p8)
}
  0x79   :  { %s3144_s11 = scalar_lea.vmem %s182_s30, 16  ;;  %s3148_s17 = scalar_lea.vmem %s182_s30, 32 }
  0x7a   :  { %p3145_p9 = scmp.ne.s32.totalorder %s182_s30, %s3144_s11  ;;  %p3149_p10 = scmp.lt.s32.totalorder %s182_s30, %s182_s30 }
  0x7b   :  { %p3150_p11 = scmp.lt.s32.totalorder %s3148_s17, %s3144_s11 }
  0x7d   :  { %p3151_p12 = por %p3150_p11, %p3149_p10 }
  0x7f   :  { %p3152_p13 = pnand %p3151_p12, %p3145_p9 }
  0x81   :  { %3155 = shalt.err (!%p3152_p13)
}
  0x82   :  { %184 = dma.hbm_to_vmem [thread:$0]  %s3993_s13, 16, %s182_s30, [#allocation24]  }
  0x83   :  { %s3999_s9 = sld [smem:[#allocation39_spill]] }
  0x89   :  { %s3156_s24 = scalar_lea.hbm %s3999_s9, 256 }
  0x8a   :  { %p3157_p0 = scmp.ne.s32.totalorder %s3999_s9, %s3156_s24  ;;  %p3160_p1 = scmp.lt.u32.totalorder %s3156_s24, %s3999_s9 }
  0x8c   :  { %p3162_p2 = pnand %p3160_p1, %p3157_p0 }
  0x8e   :  { %3165 = shalt.err (!%p3162_p2)
}
  0x8f   :  { %s3166_s5 = scalar_lea.vmem %s3596_s25, 256  ;;  %p3171_p4 = scmp.lt.s32.totalorder %s3596_s25, %s3596_s25 }
  0x90   :  { %p3167_p3 = scmp.ne.s32.totalorder %s3596_s25, %s3166_s5  ;;  %p3172_p5 = scmp.lt.s32.totalorder %s3166_s5, %s3166_s5 }
  0x92   :  { %p3173_p6 = por %p3172_p5, %p3171_p4 }
  0x94   :  { %p3174_p7 = pnand %p3173_p6, %p3167_p3 }
  0x96   :  { %3177 = shalt.err (!%p3174_p7)
}
  0x97   :  { %42 = dma.hbm_to_vmem [thread:$0]  %s3999_s9, 256, %s3596_s25, [#allocation3], %s3398_s18, %s3398_s18, %s3399_s19  }
  0x98   :  { %s3406_s21 = smov [#allocation7]   ;;  %s3178_s11 = scalar_lea.hbm %s3982_s2, 512 }
  0x99   :  { %s60_s3 = sshll.u32 %s3406_s21, 4  ;;  %p3179_p8 = scmp.ne.s32.totalorder %s3982_s2, %s3178_s11  ;;  %s61_s3 = int_to_ptr.vmem [resolvable:$true] %s60_s3 }
  0x9a   :  { %p3182_p9 = scmp.lt.u32.totalorder %s3178_s11, %s3982_s2 }
  0x9c   :  { %p3184_p10 = pnand %p3182_p9, %p3179_p8 }
  0x9e   :  { %3187 = shalt.err (!%p3184_p10)
}
  0x9f   :  { %s3188_s28 = scalar_lea.vmem %s61_s3, 512  ;;  %p3193_p12 = scmp.lt.s32.totalorder %s61_s3, %s61_s3 }
  0xa0   :  { %p3189_p11 = scmp.ne.s32.totalorder %s61_s3, %s3188_s28  ;;  %p3194_p13 = scmp.lt.s32.totalorder %s3188_s28, %s3188_s28 }
  0xa2   :  { %p3195_p0 = por %p3194_p13, %p3193_p12 }
  0xa4   :  { %p3196_p1 = pnand %p3195_p0, %p3189_p11 }
  0xa6   :  { %3199 = shalt.err (!%p3196_p1)
}
  0xa7   :  { %s3407_s25 = smov 128   ;;  %s3408_s9 = smov 8  }
  0xa8   :  { %66 = dma.hbm_to_vmem [thread:$0]  %s3982_s2, 512, %s61_s3, [#allocation6], %s3407_s25, %s3407_s25, %s3408_s9  }
  0xa9   :  { %s3409_s7 = smov [#allocation10]   ;;  %s3410_s1 = smov [#allocation13]  }
  0xaa   :  { %s82_s0 = sshll.u32 %s3409_s7, 4  ;;  %s104_s5 = sshll.u32 %s3410_s1, 4  ;;  %s83_s0 = int_to_ptr.vmem [resolvable:$true] %s82_s0  ;;  %s105_s5 = int_to_ptr.vmem [resolvable:$true] %s104_s5 }
  0xab   :  { %s3200_s21 = scalar_lea.hbm %s3984_s4, 512 }
  0xac   :  { %p3201_p2 = scmp.ne.s32.totalorder %s3984_s4, %s3200_s21  ;;  %p3204_p3 = scmp.lt.u32.totalorder %s3200_s21, %s3984_s4 }
  0xae   :  { %p3206_p4 = pnand %p3204_p3, %p3201_p2 }
  0xb0   :  { %3209 = shalt.err (!%p3206_p4)
}
  0xb1   :  { %s3210_s2 = scalar_lea.vmem %s83_s0, 512  ;;  %p3215_p6 = scmp.lt.s32.totalorder %s83_s0, %s83_s0 }
  0xb2   :  { %p3211_p5 = scmp.ne.s32.totalorder %s83_s0, %s3210_s2  ;;  %p3216_p7 = scmp.lt.s32.totalorder %s3210_s2, %s3210_s2 }
  0xb4   :  { %p3217_p8 = por %p3216_p7, %p3215_p6 }
  0xb6   :  { %p3218_p9 = pnand %p3217_p8, %p3211_p5 }
  0xb8   :  { %3221 = shalt.err (!%p3218_p9)
}
  0xb9   :  { %88 = dma.hbm_to_vmem [thread:$0]  %s3984_s4, 512, %s83_s0, [#allocation9], %s3407_s25, %s3407_s25, %s3408_s9  }
  0xba   :  { %s3222_s28 = scalar_lea.hbm %s3986_s6, 512 }
  0xbb   :  { %p3223_p10 = scmp.ne.s32.totalorder %s3986_s6, %s3222_s28  ;;  %p3226_p11 = scmp.lt.u32.totalorder %s3222_s28, %s3986_s6 }
  0xbd   :  { %p3228_p12 = pnand %p3226_p11, %p3223_p10 }
  0xbf   :  { %3231 = shalt.err (!%p3228_p12)
}
  0xc0   :  { %s3232_s13 = scalar_lea.vmem %s105_s5, 512  ;;  %p3237_p0 = scmp.lt.s32.totalorder %s105_s5, %s105_s5 }
  0xc1   :  { %p3233_p13 = scmp.ne.s32.totalorder %s105_s5, %s3232_s13  ;;  %p3238_p1 = scmp.lt.s32.totalorder %s3232_s13, %s3232_s13 }
  0xc3   :  { %p3239_p2 = por %p3238_p1, %p3237_p0 }
  0xc5   :  { %p3240_p3 = pnand %p3239_p2, %p3233_p13 }
  0xc7   :  { %3243 = shalt.err (!%p3240_p3)
}
  0xc8   :  { %110 = dma.hbm_to_vmem [thread:$0]  %s3986_s6, 512, %s105_s5, [#allocation12], %s3407_s25, %s3407_s25, %s3408_s9  }
  0xc9   :  { %s3411_s30 = smov [#allocation16]   ;;  %s3412_s22 = smov [#allocation19]  }
  0xca   :  { %s126_s21 = sshll.u32 %s3411_s30, 4  ;;  %s148_s20 = sshll.u32 %s3412_s22, 4  ;;  %s127_s21 = int_to_ptr.vmem [resolvable:$true] %s126_s21  ;;  %s149_s20 = int_to_ptr.vmem [resolvable:$true] %s148_s20 }
  0xcb   :  { %s3244_s2 = scalar_lea.hbm %s3988_s8, 512 }
  0xcc   :  { %p3245_p4 = scmp.ne.s32.totalorder %s3988_s8, %s3244_s2  ;;  %p3248_p5 = scmp.lt.u32.totalorder %s3244_s2, %s3988_s8 }
  0xce   :  { %p3250_p6 = pnand %p3248_p5, %p3245_p4 }
  0xd0   :  { %3253 = shalt.err (!%p3250_p6)
}
  0xd1   :  { %s3254_s6 = scalar_lea.vmem %s127_s21, 512  ;;  %p3259_p8 = scmp.lt.s32.totalorder %s127_s21, %s127_s21 }
  0xd2   :  { %p3255_p7 = scmp.ne.s32.totalorder %s127_s21, %s3254_s6  ;;  %p3260_p9 = scmp.lt.s32.totalorder %s3254_s6, %s3254_s6 }
  0xd4   :  { %p3261_p10 = por %p3260_p9, %p3259_p8 }
  0xd6   :  { %p3262_p11 = pnand %p3261_p10, %p3255_p7 }
  0xd8   :  { %3265 = shalt.err (!%p3262_p11)
}
  0xd9   :  { %132 = dma.hbm_to_vmem [thread:$0]  %s3988_s8, 512, %s127_s21, [#allocation15], %s3407_s25, %s3407_s25, %s3408_s9  }
  0xda   :  { %s3266_s7 = scalar_lea.hbm %s3990_s10, 1024 }
  0xdb   :  { %p3267_p12 = scmp.ne.s32.totalorder %s3990_s10, %s3266_s7  ;;  %p3270_p13 = scmp.lt.u32.totalorder %s3266_s7, %s3990_s10 }
  0xdd   :  { %p3272_p0 = pnand %p3270_p13, %p3267_p12 }
  0xdf   :  { %3275 = shalt.err (!%p3272_p0)
}
  0xe0   :  { %s3276_s30 = scalar_lea.vmem %s149_s20, 1024  ;;  %p3281_p2 = scmp.lt.s32.totalorder %s149_s20, %s149_s20 }
  0xe1   :  { %p3277_p1 = scmp.ne.s32.totalorder %s149_s20, %s3276_s30  ;;  %p3282_p3 = scmp.lt.s32.totalorder %s3276_s30, %s3276_s30 }
  0xe3   :  { %p3283_p4 = por %p3282_p3, %p3281_p2 }
  0xe5   :  { %p3284_p5 = pnand %p3283_p4, %p3277_p1 }
  0xe7   :  { %3287 = shalt.err (!%p3284_p5)
}
  0xe8   :  { %154 = dma.hbm_to_vmem [thread:$0]  %s3990_s10, 1024, %s149_s20, [#allocation18], %s3407_s25, %s3407_s25, %s3408_s9  }
  0xe9   :  { %s3413_s22 = smov [#allocation22]   ;;  %s3414_s17 = smov [#allocation25]  }
  0xea   :  { %s171_s11 = sshll.u32 %s3413_s22, 4  ;;  %s191_s2 = sshll.u32 %s3414_s17, 4  ;;  %s172_s11 = int_to_ptr.vmem [resolvable:$true] %s171_s11  ;;  %s192_s2 = int_to_ptr.vmem [resolvable:$true] %s191_s2 }
  0xeb   :  { %s3288_s26 = scalar_lea.hbm %s3992_s12, 16 }
  0xec   :  { %p3289_p6 = scmp.ne.s32.totalorder %s3992_s12, %s3288_s26  ;;  %p3292_p7 = scmp.lt.u32.totalorder %s3288_s26, %s3992_s12 }
  0xee   :  { %p3294_p8 = pnand %p3292_p7, %p3289_p6 }
  0xf0   :  { %3297 = shalt.err (!%p3294_p8)
}
  0xf1   :  { %s3298_s10 = scalar_lea.vmem %s172_s11, 16  ;;  %s3302_s25 = scalar_lea.vmem %s172_s11, 32 }
  0xf2   :  { %p3299_p9 = scmp.ne.s32.totalorder %s172_s11, %s3298_s10  ;;  %p3303_p10 = scmp.lt.s32.totalorder %s172_s11, %s172_s11 }
  0xf3   :  { %p3304_p11 = scmp.lt.s32.totalorder %s3302_s25, %s3298_s10 }
  0xf5   :  { %p3305_p12 = por %p3304_p11, %p3303_p10 }
  0xf7   :  { %p3306_p13 = pnand %p3305_p12, %p3299_p9 }
  0xf9   :  { %3309 = shalt.err (!%p3306_p13)
}
  0xfa   :  { %174 = dma.hbm_to_vmem [thread:$0]  %s3992_s12, 16, %s172_s11, [#allocation21]  }
  0xfb   :  { %s3310_s7 = scalar_lea.hbm %s3994_s14, 16 }
  0xfc   :  { %p3311_p0 = scmp.ne.s32.totalorder %s3994_s14, %s3310_s7  ;;  %p3314_p1 = scmp.lt.u32.totalorder %s3310_s7, %s3994_s14 }
  0xfe   :  { %p3316_p2 = pnand %p3314_p1, %p3311_p0 }
 0x100   :  { %3319 = shalt.err (!%p3316_p2)
}
 0x101   :  { %s3320_s30 = scalar_lea.vmem %s192_s2, 16  ;;  %s3324_s8 = scalar_lea.vmem %s192_s2, 32 }
 0x102   :  { %p3321_p3 = scmp.ne.s32.totalorder %s192_s2, %s3320_s30  ;;  %p3325_p4 = scmp.lt.s32.totalorder %s192_s2, %s192_s2 }
 0x103   :  { %p3326_p5 = scmp.lt.s32.totalorder %s3324_s8, %s3320_s30 }
 0x105   :  { %p3327_p6 = por %p3326_p5, %p3325_p4 }
 0x107   :  { %p3328_p7 = pnand %p3327_p6, %p3321_p3 }
 0x109   :  { %3331 = shalt.err (!%p3328_p7)
}
 0x10a   :  { %194 = dma.hbm_to_vmem [thread:$0]  %s3994_s14, 16, %s192_s2, [#allocation24]  }
 0x10b   :  { %s3415_s22 = smov [#allocation26]   ;;  %s3332_s23 = scalar_lea.hbm %s3995_s15, 16 }
 0x10c   :  { %s201_s11 = sshll.u32 %s3415_s22, 4  ;;  %p3333_p8 = scmp.ne.s32.totalorder %s3995_s15, %s3332_s23  ;;  %s202_s11 = int_to_ptr.vmem [resolvable:$true] %s201_s11 }
 0x10d   :  { %p3336_p9 = scmp.lt.u32.totalorder %s3332_s23, %s3995_s15 }
 0x10f   :  { %p3338_p10 = pnand %p3336_p9, %p3333_p8 }
 0x111   :  { %3341 = shalt.err (!%p3338_p10)
}
 0x112   :  { %s3342_s28 = scalar_lea.vmem %s202_s11, 16  ;;  %s3346_s14 = scalar_lea.vmem %s202_s11, 32 }
 0x113   :  { %p3343_p11 = scmp.ne.s32.totalorder %s202_s11, %s3342_s28  ;;  %p3347_p12 = scmp.lt.s32.totalorder %s202_s11, %s202_s11 }
 0x114   :  { %p3348_p13 = scmp.lt.s32.totalorder %s3346_s14, %s3342_s28 }
 0x116   :  { %p3349_p0 = por %p3348_p13, %p3347_p12 }
 0x118   :  { %p3350_p1 = pnand %p3349_p0, %p3343_p11 }
 0x11a   :  { %3353 = shalt.err (!%p3350_p1)
}
 0x11b   :  { %204 = dma.hbm_to_vmem [thread:$0]  %s3995_s15, 16, %s202_s11, [#allocation27]  }
 0x11c   :  { %3376 = dma.done.wait [#allocation3], 256  }
 0x11d   :  { %3377 = vsyncadd [#allocation3], 4294967040 }
 0x11e   :  { %3378 = dma.done.wait [#allocation6], 768  }
 0x11f   :  { %3379 = vsyncadd [#allocation6], 4294966528 }
 0x120   :  { %3380 = dma.done.wait [#allocation9], 528  }
 0x121   :  { %3381 = vsyncadd [#allocation9], 4294966768 }
 0x122   :  { %3382 = dma.done.wait [#allocation12], 528  }
 0x123   :  { %3383 = vsyncadd [#allocation12], 4294966768 }
 0x124   :  { %3384 = dma.done.wait [#allocation15], 528  }
 0x125   :  { %3385 = vsyncadd [#allocation15], 4294966768 }
 0x126   :  { %3386 = dma.done.wait [#allocation18], 1040  }
 0x127   :  { %3387 = vsyncadd [#allocation18], 4294966256 }
 0x128   :  { %3388 = dma.done.wait [#allocation21], 32  }
 0x129   :  { %3389 = vsyncadd [#allocation21], 4294967264 }
 0x12a   :  { %3390 = dma.done.wait [#allocation24], 32  }
 0x12b   :  { %3391 = vsyncadd [#allocation24], 4294967264 }
 0x12c   :  { %3392 = dma.done.wait [#allocation27], 16  }
 0x12d   :  { %3393 = vsyncadd [#allocation27], 4294967280  ;;  %v3416_v0 = vmov 1983009808   ;;  %v273_v2 = vlaneseq  ;;  %v377_v3 = vld [vmem:[#allocation7] sm:$0xff]  ;;  %v378_v4 = vld [vmem:[#allocation7 + $0x8] sm:$0xff] }
 0x12e   :  { %v271_v1 = vunpack.c.l.s4 %v3416_v0  ;;  %v379_v5 = vld [vmem:[#allocation7 + $0x10] sm:$0xff]  ;;  %v2878_v6 = vpack.c.bf16 %v378_v4, %v377_v3  ;;  %v380_v7 = vld [vmem:[#allocation7 + $0x18] sm:$0xff]  ;;  %v3741_v8 = vld [vmem:[#allocation2] sm:$0x3]  ;;  %v3417_v16 = vmov 1934713408  }
 0x12f   :  { %v3743_v9 = vld [vmem:[#allocation2 + $0x2] sm:$0x3]  ;;  %v274_v11 = vshrl.u32 %v273_v2, 7  ;;  %v2882_v12 = vpack.c.bf16 %v380_v7, %v379_v5  ;;  %v3745_v13 = vld [vmem:[#allocation2 + $0x4] sm:$0x3]  ;;  %v303_v17 = vunpack.c.l.s4 %v3417_v16  ;;  %vm388_vm0 = vcmask 261120  }
 0x130   :  { %v272_v10 = vunpack.c.0.s8 %v271_v1  ;;  %v3747_v14 = vld [vmem:[#allocation2 + $0x6] sm:$0x3]  ;;  %v3749_v15 = vld [vmem:[#allocation2 + $0x8] sm:$0x3]  ;;  %2879 = vmatprep.subr.bf16.mxu1 %v2878_v6  ;;  %v3751_v18 = vld [vmem:[#allocation2 + $0xa] sm:$0x3]  ;;  %v269_v21 = vcombine.low %v3741_v8, %v3745_v13 }
 0x131   :  { %v259_v19 = vld [vmem:[#allocation2 + $0xc] sm:$0x3]  ;;  %v260_v20 = vld [vmem:[#allocation2 + $0xe] sm:$0x3]  ;;  %v277_v22 = vcombine.low %v3743_v9, %v3747_v14  ;;  %2881 = vmatpush3.bf16.msra.mxu1 %v2878_v6  ;;  %v261_v23 = vld [vmem:[#allocation5] sm:$0x3]  ;;  %v304_v37 = vunpack.c.0.s8 %v303_v17 }
 0x132   :  { %v262_v24 = vld [vmem:[#allocation5 + $0x2] sm:$0x3]  ;;  %v263_v25 = vld [vmem:[#allocation5 + $0x4] sm:$0x3]  ;;  %v285_v26 = vcombine.low %v3749_v15, %v259_v19  ;;  %v293_v27 = vcombine.low %v3751_v18, %v260_v20  ;;  %2883 = vmatprep.subr.bf16.mxu1 %v2882_v12  ;;  %v264_v28 = vld [vmem:[#allocation5 + $0x6] sm:$0x3]  ;;  %v3759_v31 = vsub.s32 %v272_v10, %v274_v11  ;;  %v319_v32 = vadd.f32 %v261_v23, %v3741_v8 }
 0x133   :  { %v265_v29 = vld [vmem:[#allocation5 + $0x8] sm:$0x3]  ;;  %v266_v30 = vld [vmem:[#allocation5 + $0xa] sm:$0x3]  ;;  %v320_v33 = vadd.f32 %v262_v24, %v3743_v9  ;;  %v321_v34 = vadd.f32 %v263_v25, %v3745_v13  ;;  %v267_v35 = vld [vmem:[#allocation5 + $0xc] sm:$0x3]  ;;  %v322_v38 = vadd.f32 %v264_v28, %v3747_v14  ;;  %v3768_v48 = vsub.s32 %v304_v37, %v274_v11 }
 0x134   :  { %v268_v36 = vld [vmem:[#allocation5 + $0xe] sm:$0x3]  ;;  %v323_v39 = vadd.f32 %v265_v29, %v3749_v15  ;;  %v324_v40 = vadd.f32 %v266_v30, %v3751_v18  ;;  %v325_v41 = vadd.f32 %v267_v35, %v259_v19  ;;  %v470_v58 = vld [vmem:[#allocation10] sm:$0xff]  ;;  %v471_v59 = vld [vmem:[#allocation10 + $0x8] sm:$0xff]  ;;  %v3418_v63 = vmov 0.0   ;;  %s3420_s15 = smov 96  }
 0x135   :  { %v326_v42 = vadd.f32 %v268_v36, %v260_v20  ;;  %v327_v43 = vcombine.low %v319_v32, %v321_v34  ;;  %2885 = vmatpush3.bf16.msra.mxu1 %v2882_v12  ;;  %v335_v44 = vcombine.low %v320_v33, %v322_v38  ;;  %v472_v60 = vld [vmem:[#allocation10 + $0x10] sm:$0xff]  ;;  %v2886_v61 = vpack.c.bf16 %v471_v59, %v470_v58  ;;  %v473_v62 = vld [vmem:[#allocation10 + $0x18] sm:$0xff]  ;;  %v2608_v18 = vld [vmem:[#allocation11] ss:$0 sm:$0xff]  ;;  %s3421_s25 = smov 88   ;;  %s3422_s9 = smov 120  }
 0x136   :  { %v343_v46 = vcombine.low %v323_v39, %v325_v41  ;;  %2748 = vmatprep.subr.mxu0 %v3418_v63  ;;  %v2890_v0 = vpack.c.bf16 %v473_v62, %v472_v60  ;;  %v276_v1 = vrot.slane %v269_v21, %v3759_v31  ;;  %v284_v2 = vrot.slane %v277_v22, %v3759_v31  ;;  %v2605_v11 = vld [vmem:[#allocation8] ss:$0 sm:$0xff]  ;;  %s3423_s20 = smov 80   ;;  %s3424_s24 = smov 112  }
 0x137   :  { %v334_v45 = vrot.slane %v327_v43, %v3759_v31  ;;  %v351_v47 = vcombine.low %v324_v40, %v326_v42  ;;  %v342_v49 = vrot.slane %v335_v44, %v3759_v31  ;;  %2887 = vmatprep.subr.bf16.mxu1 %v2886_v61  ;;  %v292_v3 = vrot.slane %v285_v26, %v3759_v31  ;;  %v893_v40 = vld [vmem:[#allocation13] sm:$0xff]  ;;  %s3425_s29 = smov 104   ;;  %s3426_s7 = smov 72  }
 0x138   :  { %v350_v50 = vrot.slane %v343_v46, %v3759_v31  ;;  %v300_v4 = vrot.slane %v293_v27, %v3759_v31  ;;  %v301_v5 = vcombine.low %v276_v1, %v284_v2  ;;  %vm3419_vm1 = vmmov 0   ;;  %s3427_s1 = smov [#allocation28]  }
 0x139   :  { %v358_v51 = vrot.slane %v351_v47, %v3759_v31  ;;  %v359_v52 = vcombine.low %v334_v45, %v342_v49  ;;  %2750 = vmatprep.mubr.msk.f32.mxu0 %vm3419_vm1, %v3418_v63  ;;  %vm573_vm2 = vcmask 64512   ;;  %vm2377_vm3 = vcmask 523264   ;;  %s2585_s13 = sshll.u32 %s3427_s1, 4  ;;  %s2586_s13 = int_to_ptr.vmem [resolvable:$true] %s2585_s13 }
 0x13a   :  { %v309_v6 = vcombine.low %v292_v3, %v300_v4  ;;  %v308_v7 = vrot.slane %v301_v5, %v3768_v48  ;;  %vm2571_vm4 = vcmask 254976   ;;  %s3354_s4 = scalar_lea.vmem %s2586_s13, 256  ;;  %p3359_p3 = scmp.lt.s32.totalorder %s2586_s13, %s2586_s13 }
 0x13b   :  { %v367_v53 = vcombine.low %v350_v50, %v358_v51  ;;  %v366_v54 = vrot.slane %v359_v52, %v3768_v48  ;;  %p3355_p2 = scmp.ne.s32.totalorder %s2586_s13, %s3354_s4  ;;  %p3360_p4 = scmp.lt.s32.totalorder %s3354_s4, %s3354_s4 }
 0x13c   :  { %v316_v8 = vrot.slane %v309_v6, %v3768_v48 }
 0x13d   :  { %v374_v55 = vrot.slane %v367_v53, %v3768_v48  ;;  %p3361_p5 = por %p3360_p4, %p3359_p3 }
 0x13e   :  { %v3785_v9 = vcombine.low %v308_v7, %v316_v8  ;;  %v3787_v10 = vcombine.high %v308_v7, %v316_v8 }
 0x13f   :  { %v375_v56 = vcombine.low %v366_v54, %v374_v55  ;;  %v376_v57 = vcombine.high %v366_v54, %v374_v55  ;;  %p3362_p6 = pnand %p3361_p5, %p3355_p2 }
 0x141   :  { %2734 = vmatprep.mubr.msk.f32.mxu1 %vm388_vm0, %v375_v56 }
 0x142   :  { %2735 = vmatmul.mubr.msk.f32.vlgmr.msra.gmra.mrb[0].mxu1 %vm388_vm0, %v376_v57 }
 0x143   :  { %2889 = vmatpush3.bf16.msra.mxu1 %v2886_v61  ;;  %2745 = vmatprep.mubr.msk.f32.mxu1 %vm388_vm0, %v3785_v9 }
 0x144   :  { %2891 = vmatprep.subr.bf16.mxu1 %v2890_v0 }
 0x147   :  { %2893 = vmatpush3.bf16.msra.mxu1 %v2890_v0 }
 0x148   :  { %2753 = vmatprep.subr.mxu1 %v3418_v63 }
 0x14a   :  { %2746 = vmatmul.mubr.msk.f32.vlgmr.msra.gmra.mrb[2].mxu1 %vm388_vm0, %v3787_v10 }
 0x14b   :  { %2755 = vmatprep.mubr.msk.f32.mxu1 %vm3419_vm1, %v3418_v63 }
 0x215   :  { %v2736_v12 = vpop.f32.mrb[0].mxu1 }
 0x216   :  { %v461_v13 = vpop.f32.mrb[1].mxu1  ;;  %v3800_v15 = vadd.f32 %v2736_v12, %v2605_v11 }
 0x217   :  { %v3797_v14 = vadd.f32 %v2605_v11, %v461_v13 }
 0x219   :  { %571 = vrot.lane.b32.xlu0 %v3797_v14, %s3420_s15 }
 0x21d   :  { %649 = vrot.lane.b32.xlu0 %v3800_v15, %s3420_s15  ;;  %v2747_v19 = vpop.f32.mrb[2].mxu1 }
 0x21e   :  { %v3815_v20 = vadd.f32 %v2747_v19, %v2608_v18  ;;  %v553_v21 = vpop.f32.mrb[3].mxu1 }
 0x21f   :  { %v3817_v22 = vadd.f32 %v2608_v18, %v553_v21 }
 0x28b   :  { %v572_v16 = vpop.permute.xlu0 %571 }
 0x28c   :  { %2749 = vmatpush3.xpose.msk.msra.mxu0 %vm573_vm2, %v572_v16 }
 0x28d   :  { %2758 = vmatprep.subr.mxu0 %v3418_v63 }
 0x28f   :  { %2751 = vmatmul.mubr.msk.f32.vlgmr.msra.gmra.mrb[0].mxu0 %vm573_vm2, %v3797_v14  ;;  %v650_v17 = vpop.permute.xlu0 %649 }
 0x290   :  { %2754 = vmatpush3.xpose.msk.msra.mxu1 %vm573_vm2, %v650_v17  ;;  %2760 = vmatprep.mubr.msk.f32.mxu0 %vm3419_vm1, %v3418_v63 }
 0x291   :  { %2763 = vmatprep.subr.mxu1 %v3418_v63  ;;  %2759 = vmatpush3.msra.mxu0 %v3817_v22 }
 0x292   :  { %2768 = vmatprep.subr.mxu0 %v893_v40 }
 0x293   :  { %2756 = vmatmul.mubr.msk.f32.vlgmr.msra.gmra.mrb[4].mxu1 %vm573_vm2, %v3800_v15 }
 0x294   :  { %2765 = vmatprep.mubr.msk.f32.mxu1 %vm3419_vm1, %v3418_v63  ;;  %2764 = vmatpush3.msra.mxu1 %v3815_v20 }
 0x295   :  { %2773 = vmatprep.subr.mxu1 %v3418_v63 }
 0x362   :  { %v644_v23 = vpop.f32.mrb[0].mxu0 }
 0x363   :  { %v2752_v24 = vpop.f32.mrb[1].mxu0  ;;  %v725_v25 = vsel %vm573_vm2, %v644_v23, -inf }
 0x364   :  { %726 = vmax.xlane.f32.xlu1 %v725_v25 }
 0x366   :  { %v721_v26 = vpop.f32.mrb[4].mxu1 }
 0x367   :  { %v2757_v27 = vpop.f32.mrb[5].mxu1  ;;  %v728_v28 = vsel %vm573_vm2, %v721_v26, -inf }
 0x368   :  { %729 = vmax.xlane.f32.xlu1 %v728_v28 }
 0x3f1   :  { %v727_v29 = vpop.xlane.xlu1 %726 }
 0x3f2   :  { %v731_v30 = vsub.f32 %v644_v23, %v727_v29 }
 0x3f4   :  { %v733_v32 = vmul.f32 1.442695, %v731_v30 }
 0x3f5   :  { %v730_v33 = vpop.xlane.xlu1 %729 }
 0x3f6   :  { %2962 = vpow2.f32 %v733_v32  ;;  %v732_v34 = vsub.f32 %v721_v26, %v730_v33 }
 0x3f8   :  { %v735_v35 = vmul.f32 1.442695, %v732_v34 }
 0x3fa   :  { %2964 = vpow2.f32 %v735_v35 }
 0x400   :  { %v2963_v36 = vpop.eup %2962 }
 0x401   :  { %v737_v37 = vsel %vm573_vm2, %v2963_v36, 0.0 }
 0x402   :  { %738 = vadd.xlane.f32.xlu0 %v737_v37 }
 0x404   :  { %v2965_v38 = vpop.eup %2964 }
 0x405   :  { %v740_v39 = vsel %vm573_vm2, %v2965_v38, 0.0 }
 0x406   :  { %741 = vadd.xlane.f32.xlu1 %v740_v39 }
 0x417   :  { %979 = vrot.lane.b32.xlu1 %v3797_v14, %s3421_s25 }
 0x41b   :  { %977 = vrot.lane.b32.xlu1 %v3797_v14, %s3422_s9 }
 0x41f   :  { %1057 = vrot.lane.b32.xlu1 %v3800_v15, %s3421_s25 }
 0x423   :  { %1055 = vrot.lane.b32.xlu1 %v3800_v15, %s3422_s9 }
 0x48f   :  { %v739_v41 = vpop.xlane.xlu0 %738 }
 0x490   :  { %2966 = vrcp.f32 %v739_v41 }
 0x493   :  { %v742_v42 = vpop.xlane.xlu1 %741 }
 0x494   :  { %2968 = vrcp.f32 %v742_v42 }
 0x497   :  { %v980_v46 = vpop.permute.xlu1 %979 }
 0x49a   :  { %v2967_v43 = vpop.eup %2966 }
 0x49b   :  { %v745_v44 = vmul.f32 %v2967_v43, %v2963_v36  ;;  %v978_v49 = vpop.permute.xlu1 %977  ;;  %v1309_v36 = vld [vmem:[#allocation13 + $0x8] sm:$0xff] }
 0x49d   :  { %2761 = vmatmul.mubr.msk.f32.vlgmr.msra.gmra.mrb[2].mxu0 %vm573_vm2, %v745_v44 }
 0x49e   :  { %v2969_v45 = vpop.eup %2968  ;;  %2769 = vmatpush3.msra.mxu0 %v893_v40 }
 0x49f   :  { %v746_v47 = vmul.f32 %v2969_v45, %v2965_v38  ;;  %2778 = vmatprep.subr.mxu0 %v3418_v63  ;;  %v1058_v52 = vpop.permute.xlu1 %1057 }
 0x4a1   :  { %2766 = vmatmul.mubr.msk.f32.vlgmr.msra.gmra.mrb[6].mxu1 %vm573_vm2, %v746_v47 }
 0x4a2   :  { %2774 = vmatpush3.xpose.msk.msra.mxu1 %vm573_vm2, %v980_v46  ;;  %2775 = vmatprep.mubr.msk.f32.mxu1 %vm3419_vm1, %v3418_v63 }
 0x4a3   :  { %2783 = vmatprep.subr.mxu1 %v3418_v63  ;;  %v1056_v55 = vpop.permute.xlu1 %1055 }
 0x4a5   :  { %2776 = vmatmul.mubr.msk.f32.vlgmr.msra.gmra.mrb[8].mxu1 %vm573_vm2, %v978_v49 }
 0x4a6   :  { %2785 = vmatprep.mubr.msk.f32.mxu1 %vm3419_vm1, %v3418_v63 }
 0x570   :  { %v816_v50 = vpop.f32.mrb[2].mxu0 }
 0x571   :  { %v2762_v51 = vpop.f32.mrb[3].mxu0  ;;  %2770 = vmatprep.mubr.msk.f32.mxu0 %vm573_vm2, %v816_v50 }
 0x574   :  { %v889_v53 = vpop.f32.mrb[6].mxu1 }
 0x575   :  { %v2767_v54 = vpop.f32.mrb[7].mxu1  ;;  %2771 = vmatmul.mubr.msk.f32.vlgmr.msra.gmra.mrb[4].mxu0 %vm573_vm2, %v889_v53  ;;  %v1723_v53 = vld [vmem:[#allocation13 + $0x10] sm:$0xff] }
 0x576   :  { %2779 = vmatpush3.xpose.msk.msra.mxu0 %vm573_vm2, %v1058_v52  ;;  %2780 = vmatprep.mubr.msk.f32.mxu0 %vm3419_vm1, %v3418_v63 }
 0x577   :  { %2788 = vmatprep.subr.mxu0 %v3418_v63 }
 0x578   :  { %v1051_v56 = vpop.f32.mrb[8].mxu1 }
 0x579   :  { %v2777_v57 = vpop.f32.mrb[9].mxu1  ;;  %2781 = vmatmul.mubr.msk.f32.vlgmr.msra.gmra.mrb[6].mxu0 %vm573_vm2, %v1056_v55  ;;  %v1133_v58 = vsel %vm573_vm2, %v1051_v56, -inf }
 0x57a   :  { %1134 = vmax.xlane.f32.xlu0 %v1133_v58  ;;  %2790 = vmatprep.mubr.msk.f32.mxu0 %vm3419_vm1, %v3418_v63 }
 0x590   :  { %1156 = vrot.lane.b32.xlu0 %v3817_v22, %s3422_s9 }
 0x594   :  { %1395 = vrot.lane.b32.xlu0 %v3797_v14, %s3423_s20 }
 0x598   :  { %1393 = vrot.lane.b32.xlu0 %v3797_v14, %s3424_s24 }
 0x59c   :  { %1473 = vrot.lane.b32.xlu0 %v3800_v15, %s3423_s20 }
 0x5a0   :  { %1471 = vrot.lane.b32.xlu0 %v3800_v15, %s3424_s24 }
 0x607   :  { %v1135_v59 = vpop.xlane.xlu0 %1134 }
 0x608   :  { %v1139_v60 = vsub.f32 %v1051_v56, %v1135_v59 }
 0x60a   :  { %v1141_v61 = vmul.f32 1.442695, %v1139_v60 }
 0x60b   :  { %v1157_v62 = vpop.permute.xlu0 %1156 }
 0x60c   :  { %2970 = vpow2.f32 %v1141_v61  ;;  %2784 = vmatpush3.msra.mxu1 %v1157_v62 }
 0x60d   :  { %2798 = vmatprep.subr.mxu1 %v3418_v63 }
 0x60f   :  { %v1396_v6 = vpop.permute.xlu0 %1395 }
 0x613   :  { %v1394_v7 = vpop.permute.xlu0 %1393 }
 0x616   :  { %v2971_v0 = vpop.eup %2970 }
 0x617   :  { %v1145_v1 = vsel %vm573_vm2, %v2971_v0, 0.0  ;;  %v1474_v12 = vpop.permute.xlu0 %1473 }
 0x618   :  { %1146 = vadd.xlane.f32.xlu1 %v1145_v1 }
 0x61b   :  { %v1472_v13 = vpop.permute.xlu0 %1471 }
 0x64c   :  { %v1129_v2 = vpop.f32.mrb[6].mxu0 }
 0x64d   :  { %v2782_v3 = vpop.f32.mrb[7].mxu0  ;;  %v1136_v4 = vsel %vm573_vm2, %v1129_v2, -inf }
 0x64e   :  { %1137 = vmax.xlane.f32.xlu1 %v1136_v4 }
 0x65f   :  { %1233 = vrot.lane.b32.xlu1 %v3815_v20, %s3422_s9 }
 0x6a5   :  { %v1147_v5 = vpop.xlane.xlu1 %1146 }
 0x6a6   :  { %2972 = vrcp.f32 %v1147_v5 }
 0x6b0   :  { %v2973_v8 = vpop.eup %2972 }
 0x6b1   :  { %v1153_v11 = vmul.f32 %v2973_v8, %v2971_v0 }
 0x6b3   :  { %2786 = vmatmul.mubr.msk.f32.vlgmr.msra.gmra.mrb[10].mxu1 %vm573_vm2, %v1153_v11 }
 0x6b4   :  { %2799 = vmatpush3.xpose.msk.msra.mxu1 %vm573_vm2, %v1396_v6  ;;  %2800 = vmatprep.mubr.msk.f32.mxu1 %vm3419_vm1, %v3418_v63 }
 0x6b5   :  { %2803 = vmatprep.subr.mxu1 %v3418_v63 }
 0x6b7   :  { %2801 = vmatmul.mubr.msk.f32.vlgmr.msra.gmra.mrb[12].mxu1 %vm573_vm2, %v1394_v7 }
 0x6b8   :  { %2804 = vmatpush3.xpose.msk.msra.mxu1 %vm573_vm2, %v1474_v12  ;;  %2805 = vmatprep.mubr.msk.f32.mxu1 %vm3419_vm1, %v3418_v63 }
 0x6b9   :  { %2813 = vmatprep.subr.mxu1 %v3418_v63 }
 0x6bb   :  { %2806 = vmatmul.mubr.msk.f32.vlgmr.msra.gmra.mrb[14].mxu1 %vm573_vm2, %v1472_v13 }
 0x6bc   :  { %2815 = vmatprep.mubr.msk.f32.mxu1 %vm3419_vm1, %v3418_v63 }
 0x6db   :  { %v1138_v16 = vpop.xlane.xlu1 %1137 }
 0x6dc   :  { %v1140_v17 = vsub.f32 %v1129_v2, %v1138_v16 }
 0x6de   :  { %v1143_v18 = vmul.f32 1.442695, %v1140_v17 }
 0x6df   :  { %v1234_v19 = vpop.permute.xlu1 %1233 }
 0x6e0   :  { %2974 = vpow2.f32 %v1143_v18  ;;  %2789 = vmatpush3.msra.mxu0 %v1234_v19 }
 0x6e1   :  { %2793 = vmatprep.subr.mxu0 %v1309_v36 }
 0x6ea   :  { %v2975_v21 = vpop.eup %2974 }
 0x6eb   :  { %v1148_v23 = vsel %vm573_vm2, %v2975_v21, 0.0 }
 0x6ec   :  { %1149 = vadd.xlane.f32.xlu0 %v1148_v23 }
 0x779   :  { %v1150_v24 = vpop.xlane.xlu0 %1149 }
 0x77a   :  { %2976 = vrcp.f32 %v1150_v24 }
 0x784   :  { %v2977_v25 = vpop.eup %2976 }
 0x785   :  { %v1154_v26 = vmul.f32 %v2977_v25, %v2975_v21 }
 0x786   :  { %v1228_v27 = vpop.f32.mrb[10].mxu1 }
 0x787   :  { %v2787_v28 = vpop.f32.mrb[11].mxu1  ;;  %2791 = vmatmul.mubr.msk.f32.vlgmr.msra.gmra.mrb[8].mxu0 %vm573_vm2, %v1154_v26 }
 0x788   :  { %2795 = vmatprep.mubr.msk.f32.mxu0 %vm573_vm2, %v1228_v27  ;;  %2794 = vmatpush3.msra.mxu0 %v1309_v36  ;;  %v2137_v28 = vld [vmem:[#allocation13 + $0x18] sm:$0xff] }
 0x789   :  { %2808 = vmatprep.subr.mxu0 %v3418_v63 }
 0x78a   :  { %v1467_v29 = vpop.f32.mrb[12].mxu1 }
 0x78b   :  { %v2802_v30 = vpop.f32.mrb[13].mxu1  ;;  %v1549_v32 = vsel %vm573_vm2, %v1467_v29, -inf }
 0x78c   :  { %1550 = vmax.xlane.f32.xlu1 %v1549_v32 }
 0x78e   :  { %v1545_v33 = vpop.f32.mrb[14].mxu1 }
 0x78f   :  { %v2807_v34 = vpop.f32.mrb[15].mxu1  ;;  %v1552_v35 = vsel %vm573_vm2, %v1545_v33, -inf }
 0x790   :  { %1553 = vmax.xlane.f32.xlu0 %v1552_v35 }
 0x79d   :  { %1647 = vrot.lane.b32.xlu1 %v3815_v20, %s3424_s24 }
 0x7a1   :  { %1807 = vrot.lane.b32.xlu1 %v3797_v14, %s3425_s29 }
 0x819   :  { %v1551_v37 = vpop.xlane.xlu1 %1550 }
 0x81a   :  { %v1555_v38 = vsub.f32 %v1467_v29, %v1551_v37 }
 0x81c   :  { %v1557_v39 = vmul.f32 1.442695, %v1555_v38 }
 0x81d   :  { %v1554_v40 = vpop.xlane.xlu0 %1553  ;;  %v1648_v41 = vpop.permute.xlu1 %1647 }
 0x81e   :  { %2978 = vpow2.f32 %v1557_v39  ;;  %v1556_v42 = vsub.f32 %v1545_v33, %v1554_v40  ;;  %2814 = vmatpush3.msra.mxu1 %v1648_v41 }
 0x81f   :  { %2823 = vmatprep.subr.mxu1 %v3418_v63 }
 0x820   :  { %v1559_v43 = vmul.f32 1.442695, %v1556_v42 }
 0x821   :  { %v1808_v58 = vpop.permute.xlu1 %1807 }
 0x822   :  { %2980 = vpow2.f32 %v1559_v43 }
 0x828   :  { %v2979_v44 = vpop.eup %2978 }
 0x829   :  { %v1561_v45 = vsel %vm573_vm2, %v2979_v44, 0.0 }
 0x82a   :  { %1562 = vadd.xlane.f32.xlu0 %v1561_v45 }
 0x82c   :  { %v2981_v46 = vpop.eup %2980 }
 0x82d   :  { %v1564_v47 = vsel %vm573_vm2, %v2981_v46, 0.0 }
 0x82e   :  { %1565 = vadd.xlane.f32.xlu0 %v1564_v47 }
 0x844   :  { %1571 = vrot.lane.b32.xlu0 %v3817_v22, %s3424_s24 }
 0x848   :  { %1809 = vrot.lane.b32.xlu0 %v3797_v14, %s3426_s7 }
 0x84c   :  { %1887 = vrot.lane.b32.xlu0 %v3800_v15, %s3426_s7 }
 0x850   :  { %1885 = vrot.lane.b32.xlu0 %v3800_v15, %s3425_s29 }
 0x85a   :  { %v1305_v49 = vpop.f32.mrb[8].mxu0 }
 0x85b   :  { %v2792_v50 = vpop.f32.mrb[9].mxu0  ;;  %2796 = vmatmul.mubr.msk.f32.vlgmr.msra.gmra.mrb[4].mxu0 %vm573_vm2, %v1305_v49 }
 0x85c   :  { %2810 = vmatprep.mubr.msk.f32.mxu0 %vm3419_vm1, %v3418_v63 }
 0x8b7   :  { %v1563_v51 = vpop.xlane.xlu0 %1562 }
 0x8b8   :  { %2982 = vrcp.f32 %v1563_v51 }
 0x8bb   :  { %v1566_v52 = vpop.xlane.xlu0 %1565 }
 0x8bc   :  { %2984 = vrcp.f32 %v1566_v52 }
 0x8bf   :  { %v1572_v54 = vpop.permute.xlu0 %1571 }
 0x8c0   :  { %2809 = vmatpush3.msra.mxu0 %v1572_v54 }
 0x8c1   :  { %2818 = vmatprep.subr.mxu0 %v1723_v53 }
 0x8c2   :  { %v2983_v14 = vpop.eup %2982 }
 0x8c3   :  { %v1569_v55 = vmul.f32 %v2983_v14, %v2979_v44  ;;  %v1810_v57 = vpop.permute.xlu0 %1809  ;;  %v2269_v14 = vld [vmem:[#allocation16 + $0x8] sm:$0xff] }
 0x8c5   :  { %2811 = vmatmul.mubr.msk.f32.vlgmr.msra.gmra.mrb[10].mxu0 %vm573_vm2, %v1569_v55 }
 0x8c6   :  { %v2985_v15 = vpop.eup %2984  ;;  %2819 = vmatpush3.msra.mxu0 %v1723_v53 }
 0x8c7   :  { %v1570_v56 = vmul.f32 %v2985_v15, %v2981_v46  ;;  %2828 = vmatprep.subr.mxu0 %v3418_v63  ;;  %v1888_v61 = vpop.permute.xlu0 %1887  ;;  %v2270_v15 = vld [vmem:[#allocation16 + $0x10] sm:$0xff] }
 0x8c9   :  { %2816 = vmatmul.mubr.msk.f32.vlgmr.msra.gmra.mrb[16].mxu1 %vm573_vm2, %v1570_v56  ;;  %v2271_v56 = vld [vmem:[#allocation16 + $0x18] sm:$0xff] }
 0x8ca   :  { %2824 = vmatpush3.xpose.msk.msra.mxu1 %vm573_vm2, %v1810_v57  ;;  %2825 = vmatprep.mubr.msk.f32.mxu1 %vm3419_vm1, %v3418_v63  ;;  %v2898_v57 = vpack.c.bf16 %v2271_v56, %v2270_v15 }
 0x8cb   :  { %2833 = vmatprep.subr.mxu1 %v3418_v63  ;;  %v1886_v1 = vpop.permute.xlu0 %1885 }
 0x8cd   :  { %2826 = vmatmul.mubr.msk.f32.vlgmr.msra.gmra.mrb[18].mxu1 %vm573_vm2, %v1808_v58  ;;  %v2362_v58 = vld [vmem:[#allocation19] sm:$0xff] }
 0x8ce   :  { %2835 = vmatprep.mubr.msk.f32.mxu1 %vm3419_vm1, %v3418_v63 }
 0x998   :  { %v1643_v59 = vpop.f32.mrb[10].mxu0 }
 0x999   :  { %v2812_v60 = vpop.f32.mrb[11].mxu0  ;;  %2820 = vmatprep.mubr.msk.f32.mxu0 %vm573_vm2, %v1643_v59  ;;  %v2363_v59 = vld [vmem:[#allocation19 + $0x8] sm:$0xff] }
 0x99a   :  { %v2364_v60 = vld [vmem:[#allocation19 + $0x10] sm:$0xff] }
 0x99c   :  { %v1719_v62 = vpop.f32.mrb[16].mxu1 }
 0x99d   :  { %v2817_v0 = vpop.f32.mrb[17].mxu1  ;;  %2821 = vmatmul.mubr.msk.f32.vlgmr.msra.gmra.mrb[4].mxu0 %vm573_vm2, %v1719_v62  ;;  %v2365_v62 = vld [vmem:[#allocation19 + $0x18] sm:$0xff] }
 0x99e   :  { %2829 = vmatpush3.xpose.msk.msra.mxu0 %vm573_vm2, %v1888_v61  ;;  %2830 = vmatprep.mubr.msk.f32.mxu0 %vm3419_vm1, %v3418_v63  ;;  %v2902_v61 = vpack.c.bf16 %v2363_v59, %v2362_v58  ;;  %v2906_v0 = vpack.c.bf16 %v2365_v62, %v2364_v60  ;;  %v2652_v58 = vld [vmem:[#allocation25] ss:$0 sm:$0xff] }
 0x99f   :  { %2838 = vmatprep.subr.mxu0 %v3418_v63 }
 0x9a0   :  { %v1881_v2 = vpop.f32.mrb[18].mxu1 }
 0x9a1   :  { %v2827_v3 = vpop.f32.mrb[19].mxu1  ;;  %2831 = vmatmul.mubr.msk.f32.vlgmr.msra.gmra.mrb[12].mxu0 %vm573_vm2, %v1886_v1  ;;  %v1963_v4 = vsel %vm573_vm2, %v1881_v2, -inf  ;;  %v2366_v1 = vld [vmem:[#allocation19 + $0x20] sm:$0xff] }
 0x9a2   :  { %1964 = vmax.xlane.f32.xlu1 %v1963_v4  ;;  %2840 = vmatprep.mubr.msk.f32.mxu0 %vm3419_vm1, %v3418_v63 }
 0xa2f   :  { %v1965_v5 = vpop.xlane.xlu1 %1964 }
 0xa30   :  { %v1969_v6 = vsub.f32 %v1881_v2, %v1965_v5  ;;  %v2367_v2 = vld [vmem:[#allocation19 + $0x28] sm:$0xff] }
 0xa31   :  { %v2910_v3 = vpack.c.bf16 %v2367_v2, %v2366_v1 }
 0xa32   :  { %v1971_v7 = vmul.f32 1.442695, %v1969_v6 }
 0xa34   :  { %2986 = vpow2.f32 %v1971_v7 }
 0xa3e   :  { %v2987_v13 = vpop.eup %2986 }
 0xa3f   :  { %v1975_v16 = vsel %vm573_vm2, %v2987_v13, 0.0 }
 0xa74   :  { %v1959_v8 = vpop.f32.mrb[12].mxu0 }
 0xa75   :  { %v2832_v11 = vpop.f32.mrb[13].mxu0  ;;  %v1966_v12 = vsel %vm573_vm2, %v1959_v8, -inf }
 0xa76   :  { %1967 = vmax.xlane.f32.xlu0 %v1966_v12 }
 0xa7a   :  { %1976 = vadd.xlane.f32.xlu0 %v1975_v16 }
 0xa90   :  { %1985 = vrot.lane.b32.xlu0 %v3817_v22, %s3425_s29 }
 0xb03   :  { %v1968_v17 = vpop.xlane.xlu0 %1967 }
 0xb04   :  { %v1970_v18 = vsub.f32 %v1959_v8, %v1968_v17 }
 0xb06   :  { %v1973_v19 = vmul.f32 1.442695, %v1970_v18 }
 0xb07   :  { %v1977_v21 = vpop.xlane.xlu0 %1976 }
 0xb08   :  { %2988 = vpow2.f32 %v1973_v19  ;;  %v2645_v19 = vld [vmem:[#allocation23] ss:$0 sm:$0xff] }
 0xb09   :  { %2990 = vrcp.f32 %v1977_v21 }
 0xb0b   :  { %v1986_v23 = vpop.permute.xlu0 %1985 }
 0xb0c   :  { %2834 = vmatpush3.msra.mxu1 %v1986_v23 }
 0xb12   :  { %v2989_v24 = vpop.eup %2988 }
 0xb13   :  { %v2991_v25 = vpop.eup %2990  ;;  %v1978_v26 = vsel %vm573_vm2, %v2989_v24, 0.0 }
 0xb14   :  { %v1983_v27 = vmul.f32 %v2991_v25, %v2987_v13  ;;  %1979 = vadd.xlane.f32.xlu1 %v1978_v26  ;;  %v2644_v13 = vld [vmem:[#allocation22] ss:$0 sm:$0xff]  ;;  %v2368_v26 = vld [vmem:[#allocation19 + $0x30] sm:$0xff] }
 0xb16   :  { %2836 = vmatmul.mubr.msk.f32.vlgmr.msra.gmra.mrb[20].mxu1 %vm573_vm2, %v1983_v27  ;;  %v2369_v27 = vld [vmem:[#allocation19 + $0x38] sm:$0xff] }
 0xb25   :  { %2061 = vrot.lane.b32.xlu1 %v3815_v20, %s3425_s29  ;;  %v2611_v20 = vld [vmem:[#allocation14] ss:$0 sm:$0xff] }
 0xba1   :  { %v1980_v22 = vpop.xlane.xlu1 %1979 }
 0xba2   :  { %2992 = vrcp.f32 %v1980_v22  ;;  %v2914_v22 = vpack.c.bf16 %v2369_v27, %v2368_v26 }
 0xba5   :  { %v2062_v29 = vpop.permute.xlu1 %2061 }
 0xba6   :  { %2839 = vmatpush3.msra.mxu0 %v2062_v29 }
 0xba7   :  { %2843 = vmatprep.subr.mxu0 %v2137_v28 }
 0xbac   :  { %v2993_v30 = vpop.eup %2992 }
 0xbad   :  { %v1984_v32 = vmul.f32 %v2993_v30, %v2989_v24 }
 0xbaf   :  { %2841 = vmatmul.mubr.msk.f32.vlgmr.msra.gmra.mrb[14].mxu0 %vm573_vm2, %v1984_v32 }
 0xbb0   :  { %2844 = vmatpush3.msra.mxu0 %v2137_v28  ;;  %v2646_v28 = vld [vmem:[#allocation17] ss:$0 sm:$0xff] }
 0xbb1   :  { %2903 = vmatprep.subr.bf16.mxu0 %v2902_v61 }
 0xbe9   :  { %v2057_v33 = vpop.f32.mrb[20].mxu1 }
 0xbea   :  { %v2837_v34 = vpop.f32.mrb[21].mxu1  ;;  %2845 = vmatprep.mubr.msk.f32.mxu0 %vm573_vm2, %v2057_v33 }
 0xc82   :  { %v2133_v35 = vpop.f32.mrb[14].mxu0 }
 0xc83   :  { %v2842_v36 = vpop.f32.mrb[15].mxu0  ;;  %2846 = vmatmul.mubr.msk.f32.vlgmr.msra.gmra.mrb[4].mxu0 %vm573_vm2, %v2133_v35 }
 0xc84   :  { %2905 = vmatpush3.bf16.msra.mxu0 %v2902_v61  ;;  %v2649_v36 = vld [vmem:[#allocation20] ss:$0 sm:$0xff]  ;;  %v2653_v61 = vld [vmem:[#allocation26] ss:$0 sm:$0xff] }
 0xc85   :  { %2907 = vmatprep.subr.bf16.mxu0 %v2906_v0 }
 0xc88   :  { %2909 = vmatpush3.bf16.msra.mxu0 %v2906_v0 }
 0xc89   :  { %2911 = vmatprep.subr.bf16.mxu0 %v2910_v3 }
 0xc8c   :  { %2913 = vmatpush3.bf16.msra.mxu0 %v2910_v3 }
 0xc8d   :  { %2915 = vmatprep.subr.bf16.mxu0 %v2914_v22 }
 0xc90   :  { %2917 = vmatpush3.bf16.msra.mxu0 %v2914_v22 }
 0xd56   :  { %v2847_v37 = vpop.f32.mrb[4].mxu0 }
 0xd57   :  { %v2918_v38 = vadd.f32 %v2847_v37, %v2611_v20  ;;  %v2210_v39 = vpop.f32.mrb[5].mxu0 }
 0xd58   :  { %v2919_v40 = vadd.f32 %v2611_v20, %v2210_v39 }
 0xd59   :  { %v2222_v41 = vadd.f32 %v2918_v38, %v3787_v10 }
 0xd5a   :  { %v2221_v42 = vadd.f32 %v2919_v40, %v3785_v9  ;;  %v2268_v9 = vld [vmem:[#allocation16] sm:$0xff] }
 0xd5b   :  { %v2228_v43 = vsel %vm388_vm0, %v2222_v41, 0.0  ;;  %v2894_v55 = vpack.c.bf16 %v2269_v14, %v2268_v9 }
 0xd5c   :  { %2229 = vadd.xlane.f32.xlu0 %v2228_v43  ;;  %v2225_v44 = vsel %vm388_vm0, %v2221_v42, 0.0 }
 0xd5d   :  { %2226 = vadd.xlane.f32.xlu1 %v2225_v44  ;;  %2895 = vmatprep.subr.bf16.mxu1 %v2894_v55 }
 0xd5e   :  { %2897 = vmatpush3.bf16.msra.mxu1 %v2894_v55 }
 0xd5f   :  { %2899 = vmatprep.subr.bf16.mxu1 %v2898_v57 }
 0xd62   :  { %2901 = vmatpush3.bf16.msra.mxu1 %v2898_v57 }
 0xde9   :  { %v2230_v45 = vpop.xlane.xlu0 %2229 }
 0xdea   :  { %v2233_v46 = vmul.f32 0.03125, %v2230_v45  ;;  %v2227_v47 = vpop.xlane.xlu1 %2226 }
 0xdeb   :  { %v2232_v49 = vmul.f32 0.03125, %v2227_v47 }
 0xdec   :  { %v2235_v50 = vsub.f32 %v2222_v41, %v2233_v46 }
 0xded   :  { %v2234_v51 = vsub.f32 %v2221_v42, %v2232_v49 }
 0xdee   :  { %v2237_v52 = vmul.f32 %v2235_v50, %v2235_v50 }
 0xdef   :  { %v2236_v53 = vmul.f32 %v2234_v51, %v2234_v51 }
 0xdf0   :  { %v2241_v54 = vsel %vm388_vm0, %v2237_v52, 0.0 }
 0xdf1   :  { %2242 = vadd.xlane.f32.xlu1 %v2241_v54  ;;  %v2238_v10 = vsel %vm388_vm0, %v2236_v53, 0.0 }
 0xdf2   :  { %2239 = vadd.xlane.f32.xlu0 %v2238_v10 }
 0xe7e   :  { %v2243_v4 = vpop.xlane.xlu1 %2242 }
 0xe7f   :  { %v2245_v5 = vmul.f32 0.03125, %v2243_v4  ;;  %v2240_v6 = vpop.xlane.xlu0 %2239 }
 0xe80   :  { %v2244_v7 = vmul.f32 0.03125, %v2240_v6 }
 0xe81   :  { %v2247_v8 = vadd.f32 1e-05, %v2245_v5 }
 0xe82   :  { %v2246_v11 = vadd.f32 1e-05, %v2244_v7 }
 0xe83   :  { %2994 = vrsqrt.f32 %v2247_v8 }
 0xe84   :  { %2996 = vrsqrt.f32 %v2246_v11 }
 0xe8d   :  { %v2995_v12 = vpop.eup %2994 }
 0xe8e   :  { %v2997_v16 = vpop.eup %2996  ;;  %v2251_v17 = vmul.f32 %v2995_v12, %v2235_v50 }
 0xe8f   :  { %v2250_v18 = vmul.f32 %v2997_v16, %v2234_v51 }
 0xe90   :  { %v2259_v21 = vmul.f32 %v2644_v13, %v2251_v17 }
 0xe91   :  { %v2258_v23 = vmul.f32 %v2644_v13, %v2250_v18 }
 0xe92   :  { %v2267_v25 = vadd.f32 %v2645_v19, %v2259_v21 }
 0xe93   :  { %v2266_v24 = vadd.f32 %v2645_v19, %v2258_v23 }
 0xe95   :  { %2856 = vmatprep.mubr.msk.f32.mxu1 %vm388_vm0, %v2266_v24 }
 0xe96   :  { %2857 = vmatmul.mubr.msk.f32.vlgmr.msra.gmra.mrb[22].mxu1 %vm388_vm0, %v2267_v25 }
 0xf69   :  { %v2858_v29 = vpop.f32.mrb[22].mxu1 }
 0xf6a   :  { %v2357_v30 = vadd.f32 %v2858_v29, %v2646_v28  ;;  %v2351_v32 = vpop.f32.mrb[23].mxu1 }
 0xf6b   :  { %v2352_v33 = vadd.f32 %v2646_v28, %v2351_v32 }
 0xf6c   :  { %v2361_v35 = vmax.f32 %v2357_v30, 0.0 }
 0xf6d   :  { %v2360_v34 = vmax.f32 %v2352_v33, 0.0 }
 0xf6f   :  { %2875 = vmatprep.mubr.msk.f32.mxu0 %vm2377_vm3, %v2360_v34 }
 0xf70   :  { %2876 = vmatmul.mubr.msk.f32.vlgmr.msra.gmra.mrb[16].mxu0 %vm2377_vm3, %v2361_v35 }
0x1043   :  { %v2877_v20 = vpop.f32.mrb[16].mxu0 }
0x1044   :  { %v2456_v37 = vadd.f32 %v2877_v20, %v2649_v36  ;;  %v2450_v38 = vpop.f32.mrb[17].mxu0 }
0x1045   :  { %v2451_v39 = vadd.f32 %v2649_v36, %v2450_v38 }
0x1046   :  { %v2460_v40 = vadd.f32 %v2456_v37, %v2267_v25 }
0x1047   :  { %v2459_v41 = vadd.f32 %v2451_v39, %v2266_v24 }
0x1048   :  { %v2466_v42 = vsel %vm388_vm0, %v2460_v40, 0.0 }
0x1049   :  { %2467 = vadd.xlane.f32.xlu1 %v2466_v42  ;;  %v2463_v43 = vsel %vm388_vm0, %v2459_v41, 0.0 }
0x104a   :  { %2464 = vadd.xlane.f32.xlu0 %v2463_v43 }
0x10d6   :  { %v2468_v44 = vpop.xlane.xlu1 %2467 }
0x10d7   :  { %v2470_v45 = vmul.f32 0.03125, %v2468_v44  ;;  %v2465_v46 = vpop.xlane.xlu0 %2464 }
0x10d8   :  { %v2469_v47 = vmul.f32 0.03125, %v2465_v46 }
0x10d9   :  { %v2472_v49 = vsub.f32 %v2460_v40, %v2470_v45 }
0x10da   :  { %v2471_v50 = vsub.f32 %v2459_v41, %v2469_v47 }
0x10db   :  { %v2474_v51 = vmul.f32 %v2472_v49, %v2472_v49 }
0x10dc   :  { %v2473_v52 = vmul.f32 %v2471_v50, %v2471_v50 }
0x10dd   :  { %v2478_v53 = vsel %vm388_vm0, %v2474_v51, 0.0 }
0x10de   :  { %2479 = vadd.xlane.f32.xlu1 %v2478_v53  ;;  %v2475_v54 = vsel %vm388_vm0, %v2473_v52, 0.0 }
0x10df   :  { %2476 = vadd.xlane.f32.xlu0 %v2475_v54 }
0x116b   :  { %v2480_v10 = vpop.xlane.xlu1 %2479 }
0x116c   :  { %v2482_v9 = vmul.f32 0.03125, %v2480_v10  ;;  %v2477_v14 = vpop.xlane.xlu0 %2476 }
0x116d   :  { %v2481_v55 = vmul.f32 0.03125, %v2477_v14 }
0x116e   :  { %v2484_v15 = vadd.f32 1e-05, %v2482_v9 }
0x116f   :  { %v2483_v56 = vadd.f32 1e-05, %v2481_v55 }
0x1170   :  { %2998 = vrsqrt.f32 %v2484_v15 }
0x1171   :  { %3000 = vrsqrt.f32 %v2483_v56 }
0x117a   :  { %v2999_v57 = vpop.eup %2998 }
0x117b   :  { %v3001_v59 = vpop.eup %3000  ;;  %v2488_v60 = vmul.f32 %v2999_v57, %v2472_v49 }
0x117c   :  { %v2487_v62 = vmul.f32 %v3001_v59, %v2471_v50 }
0x117d   :  { %v2496_v0 = vmul.f32 %v2652_v58, %v2488_v60 }
0x117e   :  { %v2495_v1 = vmul.f32 %v2652_v58, %v2487_v62 }
0x117f   :  { %v2504_v2 = vadd.f32 %v2653_v61, %v2496_v0 }
0x1180   :  { %v2503_v3 = vadd.f32 %v2653_v61, %v2495_v1 }
0x1181   :  { %v2520_v4 = vcombine.high %v2504_v2, %v3418_v63  ;;  %v2527_v5 = vrot.slane %v2504_v2, %v3759_v31 }
0x1182   :  { %v2505_v6 = vcombine.high %v2503_v3, %v3418_v63  ;;  %v2512_v7 = vrot.slane %v2503_v3, %v3759_v31 }
0x1183   :  { %v2534_v8 = vrot.slane %v2520_v4, %v3759_v31 }
0x1184   :  { %v2519_v11 = vrot.slane %v2505_v6, %v3759_v31  ;;  %v2535_v12 = vcombine.low %v2512_v7, %v2527_v5  ;;  %v2536_v13 = vcombine.high %v2512_v7, %v2527_v5 }
0x1186   :  { %v2543_v16 = vrot.slane %v2535_v12, %v3768_v48  ;;  %v2550_v17 = vrot.slane %v2536_v13, %v3768_v48  ;;  %v2551_v18 = vcombine.low %v2519_v11, %v2534_v8  ;;  %v2552_v19 = vcombine.high %v2519_v11, %v2534_v8 }
0x1188   :  { %v2559_v21 = vrot.slane %v2551_v18, %v3768_v48  ;;  %v2566_v23 = vrot.slane %v2552_v19, %v3768_v48  ;;  %v2567_v24 = vcombine.high %v2543_v16, %v3418_v63  ;;  %v2568_v25 = vcombine.high %v2550_v17, %v3418_v63  ;;  %2572 = vst.msk [vmem:[#allocation28] sm:$0x3] %vm2571_vm4, %v2543_v16 }
0x1189   :  { %2574 = vst.msk [vmem:[#allocation28 + $0x4] sm:$0x3] %vm2571_vm4, %v2550_v17 }
0x118a   :  { %v2569_v31 = vcombine.high %v2559_v21, %v3418_v63  ;;  %v2570_v26 = vcombine.high %v2566_v23, %v3418_v63  ;;  %2573 = vst.msk [vmem:[#allocation28 + $0x2] sm:$0x3] %vm2571_vm4, %v2567_v24  ;;  %2575 = vst.msk [vmem:[#allocation28 + $0x6] sm:$0x3] %vm2571_vm4, %v2568_v25 }
0x118b   :  { %2576 = vst.msk [vmem:[#allocation28 + $0x8] sm:$0x3] %vm2571_vm4, %v2559_v21  ;;  %2578 = vst.msk [vmem:[#allocation28 + $0xc] sm:$0x3] %vm2571_vm4, %v2566_v23 }
0x118c   :  { %2577 = vst.msk [vmem:[#allocation28 + $0xa] sm:$0x3] %vm2571_vm4, %v2569_v31  ;;  %2579 = vst.msk [vmem:[#allocation28 + $0xe] sm:$0x3] %vm2571_vm4, %v2570_v26 }
0x118d   :  { %3365 = shalt.err (!%p3362_p6)
}
0x118e   :  { %s3366_s8 = scalar_lea.hbm %s3996_s16, 256 }
0x118f   :  { %p3367_p7 = scmp.ne.s32.totalorder %s3996_s16, %s3366_s8  ;;  %p3370_p8 = scmp.lt.u32.totalorder %s3366_s8, %s3996_s16 }
0x1191   :  { %p3372_p9 = pnand %p3370_p8, %p3367_p7 }
0x1193   :  { %3375 = shalt.err (!%p3372_p9)
}
0x1194   :  { %2591 = dma.vmem_to_hbm [thread:$0]  %s2586_s13, 256, %s3996_s16, [#allocation4], %s3398_s18, %s3398_s18, %s3399_s19  }
0x1195   :  { %3394 = dma.done.wait [#allocation4], 256  }
0x1196   :  { %3395 = vsyncadd [#allocation4], 4294967040 }
0x1197   :  { %2595 = vsyncpa [#allocation3], 1 }
0x1198   :  { %2596 = vsyncpa [#allocation6], 1 }
0x1199   :  { %2597 = vsyncpa [#allocation9], 1 }
0x119a   :  { %2598 = vsyncpa [#allocation12], 1 }
0x119b   :  { %2599 = vsyncpa [#allocation15], 1 }
0x119c   :  { %2600 = vsyncpa [#allocation18], 1 }
0x119d   :  { %2601 = vsyncpa [#allocation21], 1 }
0x119e   :  { %2602 = vsyncpa [#allocation24], 1 }
0x119f   :  { %2603 = vsyncpa [#allocation27], 1 }
0x11a0   :  { %2604 = vsyncpa [#allocation4], 1 }

</bundles_post_ra>
